<compile_context>
chip_gen: v7x
topology: tpu7x:2x2x1
jax: 0.10.0
libtpu: 0.0.40
codegen_flags: <defaults>
</compile_context>

<pallas_src>
import functools

import jax
import jax.numpy as jnp
from jax.experimental import pallas as pl
from jax.experimental.pallas import tpu as pltpu


# ----------------------------------------------------------------------------
# Fused depthwise(3x3, pad=1) + pointwise(1x1) kernel — NCHW in, NCHW out
# ----------------------------------------------------------------------------
def dwsep_kernel(x_ref, wdw_ref, wpw_ref, bias_ref, o_ref, *, W):
    """One batch block per grid step.

    x_ref   : (B, Cin, H*W)   NCHW input, spatial flattened onto lanes
    wdw_ref : (9, Cin, 1)     depthwise taps, tap t = (dh+1)*3 + (dw+1)
    wpw_ref : (Cout, Cin)     pointwise weights (native PyTorch orientation)
    bias_ref: (Cout, 1)       fused bias = b_pw + Wpw @ b_dw
    o_ref   : (B, Cout, H*W)  NCHW output, spatial flattened onto lanes
    """
    B, cin, P = x_ref.shape
    # Pad width: >= W+1 so every out-of-image *row* tap lands in the zero pad
    # (or is killed by a column mask); rounded to 128 so the concat below is
    # lane-aligned (no lane shifting to build the padded tensor).
    PAD = ((W + 1 + 127) // 128) * 128

    x = x_ref[...]                                            # (B, Cin, P)
    zpad = jnp.zeros((B, cin, PAD), x.dtype)
    xpad = jnp.concatenate([zpad, x, zpad], axis=-1)          # (B, Cin, PAD+P+PAD)

    # Column (w) boundary masks.  The row (h) boundary is fully covered by the
    # zero padding: any tap reading outside the image either falls into the
    # pad region or is removed by the column mask (pad width >= W+1).
    w_pos = jax.lax.broadcasted_iota(jnp.int32, (1, 1, P), 2) % W
    mask_l = (w_pos > 0).astype(x.dtype)        # taps with dw = -1 (w-1 >= 0)
    mask_r = (w_pos < W - 1).astype(x.dtype)    # taps with dw = +1 (w+1 <  W)

    wdw = wdw_ref[...]                          # (9, Cin, 1)

    # Depthwise 3x3 = 9 shifted multiply-accumulates on the VPU.  Shifts are
    # static lane-offset slices of the zero-padded tensor (lane rotates ride
    # the XLU slot and overlap the VPU MACs).
    acc = None
    for dh in (-1, 0, 1):
        for dw in (-1, 0, 1):
            t = (dh + 1) * 3 + (dw + 1)
            off = PAD + dh * W + dw
            src = xpad[:, :, off:off + P]        # (B, Cin, P)
            if dw == -1:
                src = src * mask_l
            elif dw == 1:
                src = src * mask_r
            term = src * wdw[t]                  # (Cin, 1) lane-broadcast
            acc = term if acc is None else acc + term

    # Pointwise 1x1:  (Cout, Cin) @ (Cin, H*W) on the MXU — the result is
    # already in NCHW layout (Cout on sublanes, H*W lane-dense), bias fused.
    wpw = wpw_ref[...]
    bias = bias_ref[...]
    for b in range(B):                           # static, small B
        y = jnp.dot(wpw, acc[b], preferred_element_type=jnp.float32)
        o_ref[b] = (y + bias).astype(o_ref.dtype)


def depthwise_separable_conv2d(x_nchw, w_dw, b_dw, w_pw, b_pw):
    """Forward pass matching the PyTorch module (NCHW in / NCHW out)."""
    N, Cin, H, W = x_nchw.shape
    Cout = w_pw.shape[0]
    P = H * W

    # Free reshape only (NCHW is contiguous): no pads / transposes in HBM.
    x2 = x_nchw.reshape(N, Cin, P)

    # Weight prep (tiny, one-time): depthwise taps -> (9, Cin, 1) so each
    # tap's multiply broadcasts without extra in-kernel reshapes; pointwise
    # kept in its native (Cout, Cin) orientation; depthwise bias folded into
    # the pointwise bias (exact — the pointwise conv is linear).
    wdw9 = jnp.transpose(w_dw[:, 0, :, :].reshape(Cin, 9), (1, 0)).reshape(9, Cin, 1)
    wpw2 = w_pw[:, :, 0, 0]                                   # (Cout, Cin)
    bias = (b_pw + wpw2 @ b_dw).reshape(Cout, 1)              # (Cout, 1)

    # Images per grid step: keep >= 2 "parallel" steps so both v7x
    # TensorCores get work, while amortizing the per-step fixed cost on
    # single-TC v5e/v6e.  The cap keeps the per-step VMEM footprint small
    # (important on v7x's 64 MiB VMEM).
    cap = max(1, min(8, N // 2))
    B = max(d for d in range(1, cap + 1) if N % d == 0)

    out = pl.pallas_call(
        functools.partial(dwsep_kernel, W=W),
        out_shape=jax.ShapeDtypeStruct((N, Cout, P), jnp.float32),
        grid=(N // B,),
        in_specs=[
            pl.BlockSpec((B, Cin, P), lambda n: (n, 0, 0)),
            pl.BlockSpec((9, Cin, 1), lambda n: (0, 0, 0)),
            pl.BlockSpec((Cout, Cin), lambda n: (0, 0)),
            pl.BlockSpec((Cout, 1), lambda n: (0, 0)),
        ],
        out_specs=pl.BlockSpec((B, Cout, P), lambda n: (n, 0, 0)),
        compiler_params=pltpu.CompilerParams(
            dimension_semantics=("parallel",)),
    )(x2, wdw9, wpw2, bias)

    return out.reshape(N, Cout, H, W)            # free reshape, already NCHW


# ----------------------------------------------------------------------------
# Pure-JAX reference (for self-check)
# ----------------------------------------------------------------------------
def reference(x, w_dw, b_dw, w_pw, b_pw):
    dn = ("NCHW", "OIHW", "NCHW")
    y = jax.lax.conv_general_dilated(
        x, w_dw, window_strides=(1, 1), padding=((1, 1), (1, 1)),
        dimension_numbers=dn, feature_group_count=x.shape[1])
    y = y + b_dw.reshape(1, -1, 1, 1)
    y = jax.lax.conv_general_dilated(
        y, w_pw, window_strides=(1, 1), padding=((0, 0), (0, 0)),
        dimension_numbers=dn)
    return y + b_pw.reshape(1, -1, 1, 1)


# ----------------------------------------------------------------------------
if __name__ == "__main__":
    key = jax.random.PRNGKey(0)
    k1, k2, k3, k4, kx = jax.random.split(key, 5)

    # Shapes matching the S7 model's DepthwiseSeparableConv2d(64, 128) block.
    N, Cin, Cout, H, W = 2, 64, 128, 16, 16
    w_dw = jax.random.normal(k1, (Cin, 1, 3, 3), jnp.float32) * 0.05
    b_dw = jax.random.normal(k2, (Cin,), jnp.float32) * 0.05
    w_pw = jax.random.normal(k3, (Cout, Cin, 1, 1), jnp.float32) * 0.05
    b_pw = jax.random.normal(k4, (Cout,), jnp.float32) * 0.05
    x = jax.random.normal(kx, (N, Cin, H, W), jnp.float32)

    out = jax.jit(depthwise_separable_conv2d)(x, w_dw, b_dw, w_pw, b_pw)
    out = jax.block_until_ready(out)

    assert out.shape == (N, Cout, H, W), out.shape
    assert bool(jnp.all(jnp.isfinite(out)))

    ref = reference(x, w_dw, b_dw, w_pw, b_pw)
    max_err = float(jnp.max(jnp.abs(out - ref)))
    # Tolerance accounts for default-precision MXU passes and the (exact but
    # reordered) bias folding; do not tighten to ~1e-6.
    assert max_err < 1e-2, f"max abs error vs reference: {max_err}"

    print("KERNEL_OK")
</pallas_src>

<mosaic_0001>
module attributes {stable_mosaic.version = 11 : i64} {
  func.func @dwsep_kernel(%arg0: i32, %arg1: memref<1x64x256xf32, #tpu.memory_space<vmem>>, %arg2: memref<9x64x1xf32, #tpu.memory_space<vmem>>, %arg3: memref<128x64xf32, #tpu.memory_space<vmem>>, %arg4: memref<128x1xf32, #tpu.memory_space<vmem>>, %arg5: memref<1x128x256xf32, #tpu.memory_space<vmem>>) attributes {dimension_semantics = [#tpu.dimension_semantics<parallel>], iteration_bounds = array<i64: 2>, scalar_prefetch = 0 : i64, scratch_operands = 0 : i64, tpu.core_type = #tpu.core_type<tc>, window_params = [{transform_indices = @transform_0, window_bounds = array<i64: 1, 64, 256>}, {pipeline_mode = #tpu.pipeline_mode<synchronous>, transform_indices = @transform_1, window_bounds = array<i64: 9, 64, 1>}, {pipeline_mode = #tpu.pipeline_mode<synchronous>, transform_indices = @transform_2, window_bounds = array<i64: 128, 64>}, {pipeline_mode = #tpu.pipeline_mode<synchronous>, transform_indices = @transform_3, window_bounds = array<i64: 128, 1>}, {transform_indices = @transform_4, window_bounds = array<i64: 1, 128, 256>}]} {
    %c0 = arith.constant 0 : index
    %c0_0 = arith.constant 0 : index
    %c0_1 = arith.constant 0 : index
    %0 = vector.load %arg1[%c0, %c0_0, %c0_1] : memref<1x64x256xf32, #tpu.memory_space<vmem>>, vector<1x64x256xf32>
    %cst = arith.constant 0.000000e+00 : f32
    %1 = vector.broadcast %cst : f32 to vector<1x64x128xf32>
    %2 = tpu.concatenate %1, %0, %1 in 2 : vector<1x64x128xf32>, vector<1x64x256xf32>, vector<1x64x128xf32> -> vector<1x64x512xf32>
    %3 = tpu.iota {dimensions = array<i32: 2>} : vector<1x1x256xi32>
    %c16_i32 = arith.constant 16 : i32
    %c0_i32 = arith.constant 0 : i32
    %4 = arith.cmpi eq, %c16_i32, %c0_i32 : i32
    %c1_i32 = arith.constant 1 : i32
    %5 = arith.select %4, %c1_i32, %c16_i32 : i32
    %6 = vector.broadcast %5 : i32 to vector<1x1x256xi32>
    %7 = arith.remsi %3, %6 : vector<1x1x256xi32>
    %c0_i32_2 = arith.constant 0 : i32
    %8 = vector.broadcast %c0_i32_2 : i32 to vector<1x1x256xi32>
    %9 = arith.cmpi ne, %7, %8 : vector<1x1x256xi32>
    %c0_i32_3 = arith.constant 0 : i32
    %10 = vector.broadcast %c0_i32_3 : i32 to vector<1x1x256xi32>
    %11 = arith.cmpi slt, %7, %10 : vector<1x1x256xi32>
    %c0_i32_4 = arith.constant 0 : i32
    %12 = arith.cmpi slt, %5, %c0_i32_4 : i32
    %13 = vector.broadcast %12 : i1 to vector<1x1x256xi1>
    %14 = vector.broadcast %13 : vector<1x1x256xi1> to vector<1x1x256xi1>
    %15 = arith.xori %11, %14 : vector<1x1x256xi1>
    %16 = arith.andi %15, %9 : vector<1x1x256xi1>
    %17 = vector.broadcast %5 : i32 to vector<1x1x256xi32>
    %18 = arith.addi %7, %17 : vector<1x1x256xi32>
    %19 = arith.select %16, %18, %7 : vector<1x1x256xi1>, vector<1x1x256xi32>
    %c0_i32_5 = arith.constant 0 : i32
    %20 = vector.broadcast %c0_i32_5 : i32 to vector<1x1x256xi32>
    %21 = arith.cmpi sgt, %19, %20 : vector<1x1x256xi32>
    %22 = arith.extui %21 : vector<1x1x256xi1> to vector<1x1x256xi32>
    %23 = arith.sitofp %22 : vector<1x1x256xi32> to vector<1x1x256xf32>
    %c15_i32 = arith.constant 15 : i32
    %24 = vector.broadcast %c15_i32 : i32 to vector<1x1x256xi32>
    %25 = arith.cmpi slt, %19, %24 : vector<1x1x256xi32>
    %26 = arith.extui %25 : vector<1x1x256xi1> to vector<1x1x256xi32>
    %27 = arith.sitofp %26 : vector<1x1x256xi32> to vector<1x1x256xf32>
    %c0_6 = arith.constant 0 : index
    %c0_7 = arith.constant 0 : index
    %c0_8 = arith.constant 0 : index
    %28 = vector.load %arg2[%c0_6, %c0_7, %c0_8] : memref<9x64x1xf32, #tpu.memory_space<vmem>>, vector<9x64x1xf32>
    %29 = vector.extract_strided_slice %2 {offsets = [0, 0, 111], sizes = [1, 64, 256], strides = [1, 1, 1]} : vector<1x64x512xf32> to vector<1x64x256xf32>
    %30 = vector.broadcast %23 : vector<1x1x256xf32> to vector<1x64x256xf32>
    %31 = arith.mulf %29, %30 : vector<1x64x256xf32>
    %32 = vector.extract_strided_slice %28 {offsets = [0, 0, 0], sizes = [1, 64, 1], strides = [1, 1, 1]} : vector<9x64x1xf32> to vector<1x64x1xf32>
    %33 = vector.shape_cast %32 : vector<1x64x1xf32> to vector<64x1xf32>
    %34 = vector.shape_cast %33 : vector<64x1xf32> to vector<1x64x1xf32>
    %35 = vector.broadcast %34 : vector<1x64x1xf32> to vector<1x64x256xf32>
    %36 = arith.mulf %31, %35 : vector<1x64x256xf32>
    %37 = vector.extract_strided_slice %2 {offsets = [0, 0, 112], sizes = [1, 64, 256], strides = [1, 1, 1]} : vector<1x64x512xf32> to vector<1x64x256xf32>
    %38 = vector.extract_strided_slice %28 {offsets = [1, 0, 0], sizes = [1, 64, 1], strides = [1, 1, 1]} : vector<9x64x1xf32> to vector<1x64x1xf32>
    %39 = vector.shape_cast %38 : vector<1x64x1xf32> to vector<64x1xf32>
    %40 = vector.shape_cast %39 : vector<64x1xf32> to vector<1x64x1xf32>
    %41 = vector.broadcast %40 : vector<1x64x1xf32> to vector<1x64x256xf32>
    %42 = arith.mulf %37, %41 : vector<1x64x256xf32>
    %43 = arith.addf %36, %42 : vector<1x64x256xf32>
    %44 = vector.extract_strided_slice %2 {offsets = [0, 0, 113], sizes = [1, 64, 256], strides = [1, 1, 1]} : vector<1x64x512xf32> to vector<1x64x256xf32>
    %45 = vector.broadcast %27 : vector<1x1x256xf32> to vector<1x64x256xf32>
    %46 = arith.mulf %44, %45 : vector<1x64x256xf32>
    %47 = vector.extract_strided_slice %28 {offsets = [2, 0, 0], sizes = [1, 64, 1], strides = [1, 1, 1]} : vector<9x64x1xf32> to vector<1x64x1xf32>
    %48 = vector.shape_cast %47 : vector<1x64x1xf32> to vector<64x1xf32>
    %49 = vector.shape_cast %48 : vector<64x1xf32> to vector<1x64x1xf32>
    %50 = vector.broadcast %49 : vector<1x64x1xf32> to vector<1x64x256xf32>
    %51 = arith.mulf %46, %50 : vector<1x64x256xf32>
    %52 = arith.addf %43, %51 : vector<1x64x256xf32>
    %53 = vector.extract_strided_slice %2 {offsets = [0, 0, 127], sizes = [1, 64, 256], strides = [1, 1, 1]} : vector<1x64x512xf32> to vector<1x64x256xf32>
    %54 = vector.broadcast %23 : vector<1x1x256xf32> to vector<1x64x256xf32>
    %55 = arith.mulf %53, %54 : vector<1x64x256xf32>
    %56 = vector.extract_strided_slice %28 {offsets = [3, 0, 0], sizes = [1, 64, 1], strides = [1, 1, 1]} : vector<9x64x1xf32> to vector<1x64x1xf32>
    %57 = vector.shape_cast %56 : vector<1x64x1xf32> to vector<64x1xf32>
    %58 = vector.shape_cast %57 : vector<64x1xf32> to vector<1x64x1xf32>
    %59 = vector.broadcast %58 : vector<1x64x1xf32> to vector<1x64x256xf32>
    %60 = arith.mulf %55, %59 : vector<1x64x256xf32>
    %61 = arith.addf %52, %60 : vector<1x64x256xf32>
    %62 = vector.extract_strided_slice %2 {offsets = [0, 0, 128], sizes = [1, 64, 256], strides = [1, 1, 1]} : vector<1x64x512xf32> to vector<1x64x256xf32>
    %63 = vector.extract_strided_slice %28 {offsets = [4, 0, 0], sizes = [1, 64, 1], strides = [1, 1, 1]} : vector<9x64x1xf32> to vector<1x64x1xf32>
    %64 = vector.shape_cast %63 : vector<1x64x1xf32> to vector<64x1xf32>
    %65 = vector.shape_cast %64 : vector<64x1xf32> to vector<1x64x1xf32>
    %66 = vector.broadcast %65 : vector<1x64x1xf32> to vector<1x64x256xf32>
    %67 = arith.mulf %62, %66 : vector<1x64x256xf32>
    %68 = arith.addf %61, %67 : vector<1x64x256xf32>
    %69 = vector.extract_strided_slice %2 {offsets = [0, 0, 129], sizes = [1, 64, 256], strides = [1, 1, 1]} : vector<1x64x512xf32> to vector<1x64x256xf32>
    %70 = vector.broadcast %27 : vector<1x1x256xf32> to vector<1x64x256xf32>
    %71 = arith.mulf %69, %70 : vector<1x64x256xf32>
    %72 = vector.extract_strided_slice %28 {offsets = [5, 0, 0], sizes = [1, 64, 1], strides = [1, 1, 1]} : vector<9x64x1xf32> to vector<1x64x1xf32>
    %73 = vector.shape_cast %72 : vector<1x64x1xf32> to vector<64x1xf32>
    %74 = vector.shape_cast %73 : vector<64x1xf32> to vector<1x64x1xf32>
    %75 = vector.broadcast %74 : vector<1x64x1xf32> to vector<1x64x256xf32>
    %76 = arith.mulf %71, %75 : vector<1x64x256xf32>
    %77 = arith.addf %68, %76 : vector<1x64x256xf32>
    %78 = vector.extract_strided_slice %2 {offsets = [0, 0, 143], sizes = [1, 64, 256], strides = [1, 1, 1]} : vector<1x64x512xf32> to vector<1x64x256xf32>
    %79 = vector.broadcast %23 : vector<1x1x256xf32> to vector<1x64x256xf32>
    %80 = arith.mulf %78, %79 : vector<1x64x256xf32>
    %81 = vector.extract_strided_slice %28 {offsets = [6, 0, 0], sizes = [1, 64, 1], strides = [1, 1, 1]} : vector<9x64x1xf32> to vector<1x64x1xf32>
    %82 = vector.shape_cast %81 : vector<1x64x1xf32> to vector<64x1xf32>
    %83 = vector.shape_cast %82 : vector<64x1xf32> to vector<1x64x1xf32>
    %84 = vector.broadcast %83 : vector<1x64x1xf32> to vector<1x64x256xf32>
    %85 = arith.mulf %80, %84 : vector<1x64x256xf32>
    %86 = arith.addf %77, %85 : vector<1x64x256xf32>
    %87 = vector.extract_strided_slice %2 {offsets = [0, 0, 144], sizes = [1, 64, 256], strides = [1, 1, 1]} : vector<1x64x512xf32> to vector<1x64x256xf32>
    %88 = vector.extract_strided_slice %28 {offsets = [7, 0, 0], sizes = [1, 64, 1], strides = [1, 1, 1]} : vector<9x64x1xf32> to vector<1x64x1xf32>
    %89 = vector.shape_cast %88 : vector<1x64x1xf32> to vector<64x1xf32>
    %90 = vector.shape_cast %89 : vector<64x1xf32> to vector<1x64x1xf32>
    %91 = vector.broadcast %90 : vector<1x64x1xf32> to vector<1x64x256xf32>
    %92 = arith.mulf %87, %91 : vector<1x64x256xf32>
    %93 = arith.addf %86, %92 : vector<1x64x256xf32>
    %94 = vector.extract_strided_slice %2 {offsets = [0, 0, 145], sizes = [1, 64, 256], strides = [1, 1, 1]} : vector<1x64x512xf32> to vector<1x64x256xf32>
    %95 = vector.broadcast %27 : vector<1x1x256xf32> to vector<1x64x256xf32>
    %96 = arith.mulf %94, %95 : vector<1x64x256xf32>
    %97 = vector.extract_strided_slice %28 {offsets = [8, 0, 0], sizes = [1, 64, 1], strides = [1, 1, 1]} : vector<9x64x1xf32> to vector<1x64x1xf32>
    %98 = vector.shape_cast %97 : vector<1x64x1xf32> to vector<64x1xf32>
    %99 = vector.shape_cast %98 : vector<64x1xf32> to vector<1x64x1xf32>
    %100 = vector.broadcast %99 : vector<1x64x1xf32> to vector<1x64x256xf32>
    %101 = arith.mulf %96, %100 : vector<1x64x256xf32>
    %102 = arith.addf %93, %101 : vector<1x64x256xf32>
    %c0_9 = arith.constant 0 : index
    %c0_10 = arith.constant 0 : index
    %103 = vector.load %arg3[%c0_9, %c0_10] : memref<128x64xf32, #tpu.memory_space<vmem>>, vector<128x64xf32>
    %c0_11 = arith.constant 0 : index
    %c0_12 = arith.constant 0 : index
    %104 = vector.load %arg4[%c0_11, %c0_12] : memref<128x1xf32, #tpu.memory_space<vmem>>, vector<128x1xf32>
    %105 = vector.shape_cast %102 : vector<1x64x256xf32> to vector<64x256xf32>
    %cst_13 = arith.constant dense<0.000000e+00> : vector<128x256xf32>
    %106 = tpu.matmul %103, %105, %cst_13 {dimension_numbers = #tpu.dot_dimension_numbers<[1], [0], [0], [1], [0, 0, 1, 1], [], []>} : vector<128x64xf32>, vector<64x256xf32>, vector<128x256xf32> -> vector<128x256xf32>
    %107 = vector.broadcast %104 : vector<128x1xf32> to vector<128x256xf32>
    %108 = arith.addf %106, %107 : vector<128x256xf32>
    %c0_14 = arith.constant 0 : index
    %c0_15 = arith.constant 0 : index
    %c0_16 = arith.constant 0 : index
    %109 = vector.load %arg5[%c0_14, %c0_15, %c0_16] : memref<1x128x256xf32, #tpu.memory_space<vmem>>, vector<1x128x256xf32>
    %110 = vector.shape_cast %109 : vector<1x128x256xf32> to vector<128x256xf32>
    %111 = vector.shape_cast %108 : vector<128x256xf32> to vector<1x128x256xf32>
    tpu.vector_store %arg5[%c0_14, %c0_15, %c0_16], %111 {strides = array<i32>} : memref<1x128x256xf32, #tpu.memory_space<vmem>>, vector<1x128x256xf32>,
    return
  }
  func.func @transform_0(%arg0: i32) -> (i32, i32, i32) {
    %c0_i32 = arith.constant 0 : i32
    %c0_i32_0 = arith.constant 0 : i32
    %c0_i32_1 = arith.constant 0 : i32
    return %arg0, %c0_i32, %c0_i32_0 : i32, i32, i32
  }
  func.func @transform_1(%arg0: i32) -> (i32, i32, i32) {
    %c0_i32 = arith.constant 0 : i32
    %c0_i32_0 = arith.constant 0 : i32
    %c0_i32_1 = arith.constant 0 : i32
    %c0_i32_2 = arith.constant 0 : i32
    return %c0_i32, %c0_i32_0, %c0_i32_1 : i32, i32, i32
  }
  func.func @transform_2(%arg0: i32) -> (i32, i32) {
    %c0_i32 = arith.constant 0 : i32
    %c0_i32_0 = arith.constant 0 : i32
    %c0_i32_1 = arith.constant 0 : i32
    return %c0_i32, %c0_i32_0 : i32, i32
  }
  func.func @transform_3(%arg0: i32) -> (i32, i32) {
    %c0_i32 = arith.constant 0 : i32
    %c0_i32_0 = arith.constant 0 : i32
    %c0_i32_1 = arith.constant 0 : i32
    return %c0_i32, %c0_i32_0 : i32, i32
  }
  func.func @transform_4(%arg0: i32) -> (i32, i32, i32) {
    %c0_i32 = arith.constant 0 : i32
    %c0_i32_0 = arith.constant 0 : i32
    %c0_i32_1 = arith.constant 0 : i32
    return %arg0, %c0_i32, %c0_i32_0 : i32, i32, i32
  }
}

</mosaic_0001>

<bundles_post_ra>
// kernel: squeeze.2
= control target key start
LH: loop header
LB: loop body
LE: loop exit
PB: predicated region body
PF: predicated region fallthrough
CT: control target
= control target key end

     0   :  { %vm16_vm0 = vcmask 523264   ;;  %s61_s0 = inlined_call_operand.vmem [shape: f32[64,3,3], index: 0, kind: input, shape index: {}]   ;;  %s62_s1 = inlined_call_operand.vmem [shape: f32[64,9], index: 1, kind: output, shape index: {}]  }
   0x1   :  { %v29_v0 = vld [vmem:[%s61_s0 + $0x8] sm:$0xf]  ;;  %v30_v1 = vld [vmem:[%s61_s0 + $0x4] sm:$0xf]  ;;  %v13_v2 = vld [vmem:[%s61_s0] sm:$0xf] }
   0x2   :  { %8 = vst [vmem:[#allocation0 + $0x10] sm:$0xf] %v29_v0  ;;  %12 = vst [vmem:[#allocation0 + $0x8] sm:$0xf] %v30_v1 }
   0x3   :  { %14 = vst [vmem:[#allocation0] sm:$0xf] %v13_v2 }
   0x9   :  { %v19_v4 = vld [vmem:[#allocation0 + $0x8] sm:$0x7]   ;;  %v24_v5 = vld [vmem:[#allocation0 + $0x10] sm:$0x7]  }
   0xa   :  { %v15_v3 = vld [vmem:[#allocation0] sm:$0x7]   ;;  %31 = vst.msk [vmem:[%s62_s1 + $0x3] sm:$0x7] %vm16_vm0, %v19_v4   ;;  %32 = vst.msk [vmem:[%s62_s1 + $0x6] sm:$0x7] %vm16_vm0, %v24_v5  }
   0xb   :  { %17 = vst.msk [vmem:[%s62_s1] sm:$0x7] %vm16_vm0, %v15_v3  }

// kernel: depthwise_separable_conv2d.1
= control target key start
LH: loop header
LB: loop body
LE: loop exit
PB: predicated region body
PF: predicated region fallthrough
CT: control target
= control target key end

     0   :  { %s2862_s15 = smov 0   ;;  %s4752_s0 = inlined_call_operand.vmem [shape: f32[2,64,256], index: 0, kind: input, shape index: {}]   ;;  %s4753_s1 = inlined_call_operand.vmem [shape: f32[9,64,1], index: 1, kind: input, shape index: {}]   ;;  %s4754_s2 = inlined_call_operand.vmem [shape: f32[128,64], index: 2, kind: input, shape index: {}]   ;;  %s4755_s3 = inlined_call_operand.vmem [shape: f32[128,1], index: 3, kind: input, shape index: {}]   ;;  %s4756_s4 = inlined_call_operand.vmem [shape: f32[2,128,256], index: 4, kind: output, shape index: {}]  }
   0x1 LB: > { %s2628_s16 = sadd.s32 4294967295, %s2821_s15   ;;  %p2632_p0 = scmp.ge.s32.totalorder %s2821_s15, 1  ;;  %s2821_s15 = sphi %s2862_s15, %s14_s15  }
   0x2   : > { %p162_p1 = scmp.lt.s32.totalorder %s2821_s15, 3 }
   0x4   : > { %p163_p2 = pnand %p2632_p0, %p162_p1 }
   0x6   : > { %166 = sbr.rel (%p163_p2) target bundleno = 1421 (0x58d), region = 36 }
   0xd   : > { %v254_v0 = vld [vmem:[%s4753_s1 + $0x8] sm:$0xff]  ;;  %v253_v1 = vld [vmem:[%s4753_s1] sm:$0xff]  ;;  %v214_v2 = vlaneseq  ;;  %v2823_v3 = vmov 0   ;;  %v255_v5 = vld [vmem:[%s4753_s1 + $0x10] sm:$0xff]  ;;  %v4757_v6 = vmov 0.0   ;;  %s2825_s27 = smov 111  }
   0xe   : > { %2708 = vset.pattern.permute.xlu1 %v2823_v3  ;;  %2707 = vset.pattern.permute.xlu0 %v2823_v3  ;;  %v256_v10 = vld [vmem:[%s4753_s1 + $0x18] sm:$0xff]  ;;  %v258_v14 = vld [vmem:[%s4753_s1 + $0x28] sm:$0xff]  ;;  %v257_v15 = vld [vmem:[%s4753_s1 + $0x20] sm:$0xff]  ;;  %s2826_s5 = smov 113   ;;  %p188_p3 = scmp.lt.s32.totalorder %s2628_s16, 1  ;;  %vm624_vm4 = vcmask 924672  }
   0xf   : > { %360 = vperm.xlu1 %2708, %v254_v0   ;;  %355 = vperm.xlu0 %2707, %v253_v1   ;;  %v215_v4 = vand.u32 127, %v214_v2  ;;  %v260_v16 = vld [vmem:[%s4753_s1 + $0x38] sm:$0xff]  ;;  %v259_v17 = vld [vmem:[%s4753_s1 + $0x30] sm:$0xff]  ;;  %v262_v18 = vld [vmem:[%s4753_s1 + $0x48] sm:$0xff]  ;;  %s2827_s24 = smov 127   ;;  %s2828_s25 = smov 126  }
  0x10   : > { %2444 = vmatprep.mubr.f32.mxu0 %v4757_v6  ;;  %2492 = vmatprep.mubr.f32.mxu1 %v4757_v6  ;;  %v261_v19 = vld [vmem:[%s4753_s1 + $0x40] sm:$0xff]  ;;  %v264_v20 = vld [vmem:[%s4753_s1 + $0x58] sm:$0xff]  ;;  %v263_v21 = vld [vmem:[%s4753_s1 + $0x50] sm:$0xff]  ;;  %s4978_s16 = smov (!%p188_p3, %s2628_s16), 1  ;;  %vm331_vm5 = vcmask 908288   ;;  %vm553_vm6 = vcmask 1039360  }
  0x11   : > { %v216_v7 = vadd.s32 128, %v215_v4  ;;  %v221_v8 = vand.u32 15, %v215_v4  ;;  %v266_v22 = vld [vmem:[%s4753_s1 + $0x68] sm:$0xff]  ;;  %v265_v23 = vld [vmem:[%s4753_s1 + $0x60] sm:$0xff]  ;;  %v268_v24 = vld [vmem:[%s4753_s1 + $0x78] sm:$0xff]  ;;  %s2659_s20 = sshll.u32 %s4978_s16, 7 }
  0x12   : > { %v267_v25 = vld [vmem:[%s4753_s1 + $0x70] sm:$0xff]  ;;  %v269_v28 = vld [vmem:[%s4753_s1 + $0x80] sm:$0xff]  ;;  %v270_v31 = vld [vmem:[%s4753_s1 + $0x88] sm:$0xff]  ;;  %s2983_s23 = scalar_lea.vmem %s4752_s0, %s2659_s20  ;;  %vm782_vm7 = vcmask 1031168   ;;  %s2829_s19 = smov 112   ;;  %vm1008_vm8 = vcmask 916480  }
  0x13   : > { %365 = vperm.xlu1 %2708, %v255_v5   ;;  %v228_v9 = vand.u32 15, %v216_v7  ;;  %vm241_vm0 = vcmp.gt.s32.totalorder %v221_v8, 0  ;;  %vm247_vm2 = vcmp.lt.s32.totalorder %v221_v8, 15  ;;  %v271_v30 = vld [vmem:[%s4753_s1 + $0x90] sm:$0xff]  ;;  %v273_v32 = vld [vmem:[%s4753_s1 + $0xa0] sm:$0xff]  ;;  %v272_v33 = vld [vmem:[%s4753_s1 + $0x98] sm:$0xff] }
  0x14   : > { %v2637_v11 = vsel %vm241_vm0, 1.0, %v4757_v6  ;;  %v2639_v26 = vsel %vm247_vm2, 1.0, %v4757_v6  ;;  %v275_v34 = vld [vmem:[%s4753_s1 + $0xb0] sm:$0xff]  ;;  %v274_v35 = vld [vmem:[%s4753_s1 + $0xa8] sm:$0xff]  ;;  %v276_v36 = vld [vmem:[%s4753_s1 + $0xb8] sm:$0xff]  ;;  %s2830_s22 = smov 1  }
  0x15   : > { %vm242_vm1 = vcmp.gt.s32.totalorder %v228_v9, 0  ;;  %vm248_vm3 = vcmp.lt.s32.totalorder %v228_v9, 15  ;;  %v2986_v47 = vld [vmem:[%s2983_s23] sm:$0xff]  ;;  %v2992_v51 = vld [vmem:[%s2983_s23 + $0x8] sm:$0xff]  ;;  %v2998_v54 = vld [vmem:[%s2983_s23 + $0x10] sm:$0xff]  ;;  %s2831_s9 = smov 15  }
  0x16   : > { %v2638_v12 = vsel %vm242_vm1, 1.0, %v4757_v6  ;;  %v2640_v27 = vsel %vm248_vm3, 1.0, %v4757_v6  ;;  %v3001_v55 = vld [vmem:[%s2983_s23 + $0x18] sm:$0xff]  ;;  %v3008_v59 = vld [vmem:[%s2983_s23 + $0x20] sm:$0xff]  ;;  %v3014_v63 = vld [vmem:[%s2983_s23 + $0x28] sm:$0xff]  ;;  %s2832_s6 = smov 17  }
  0x17   : > { %370 = vperm.xlu1 %2708, %v256_v10   ;;  %v2886_v13 = vpack.i.bf16 %v2638_v12, %v2637_v11  ;;  %v2931_v29 = vpack.i.bf16 %v2640_v27, %v2639_v26  ;;  %v3020_v2 = vld [vmem:[%s2983_s23 + $0x30] sm:$0xff]  ;;  %v3023_v3 = vld [vmem:[%s2983_s23 + $0x38] sm:$0xff]  ;;  %v3030_v8 = vld [vmem:[%s2983_s23 + $0x40] sm:$0xff]  ;;  %vm1237_vm9 = vcmask 7168   ;;  %s2833_s14 = smov 110   ;;  %vm1464_vm10 = vcmask 121856  }
  0x18   : > { %v3036_v12 = vld [vmem:[%s2983_s23 + $0x48] sm:$0xff]  ;;  %s2834_s17 = smov 96   ;;  %s2835_s18 = smov 95   ;;  %vm1892_vm11 = vcmask 138240   ;;  %vm1395_vm12 = vcmask 900096   ;;  %vm1622_vm13 = vcmask 785408  }
  0x19   : > { %2710 = vrot.lane.b32.xlu0 %v2886_v13, %s2825_s27  ;;  %vm1823_vm14 = vcmask 777216   ;;  %vm2050_vm15 = vcmask 769024   ;;  %vm2331_vm0 = vcmask 523264   ;;  %s2660_s10 = sshll.u32 %s4978_s16, 8 }
  0x1a   : > { %s4707_s13 = scalar_lea.vmem %s4756_s4, %s2660_s10 }
  0x1b   : > { %380 = vperm.xlu1 %2708, %v258_v14  }
  0x1d   : > { %375 = vperm.xlu0 %2707, %v257_v15  }
  0x1f   : > { %390 = vperm.xlu1 %2708, %v260_v16  }
  0x21   : > { %385 = vperm.xlu0 %2707, %v259_v17   ;;  %v3042_v17 = vld [vmem:[%s2983_s23 + $0x50] sm:$0xff] }
  0x23   : > { %424 = vperm.xlu1 %2708, %v262_v18   ;;  %v3045_v18 = vld [vmem:[%s2983_s23 + $0x58] sm:$0xff] }
  0x25   : > { %419 = vperm.xlu0 %2707, %v261_v19  }
  0x27   : > { %434 = vperm.xlu1 %2708, %v264_v20  }
  0x29   : > { %429 = vperm.xlu0 %2707, %v263_v21  }
  0x2b   : > { %444 = vperm.xlu1 %2708, %v266_v22   ;;  %v3052_v22 = vld [vmem:[%s2983_s23 + $0x60] sm:$0xff] }
  0x2d   : > { %439 = vperm.xlu0 %2707, %v265_v23  }
  0x2f   : > { %454 = vperm.xlu1 %2708, %v268_v24  }
  0x31   : > { %449 = vperm.xlu0 %2707, %v267_v25  }
  0x33   : > { %648 = vperm.xlu1 %2708, %v269_v28   ;;  %v3060_v28 = vld [vmem:[%s2983_s23 + $0x68] sm:$0xff] }
  0x35   : > { %2715 = vrot.lane.b32.xlu0 %v2931_v29, %s2826_s5 }
  0x37   : > { %658 = vperm.xlu1 %2708, %v271_v30  }
  0x39   : > { %653 = vperm.xlu0 %2707, %v270_v31  }
  0x3b   : > { %668 = vperm.xlu1 %2708, %v273_v32  }
  0x3d   : > { %663 = vperm.xlu0 %2707, %v272_v33   ;;  %v3069_v33 = vld [vmem:[%s2983_s23 + $0x70] sm:$0xff] }
  0x3f   : > { %678 = vperm.xlu1 %2708, %v275_v34   ;;  %v3072_v34 = vld [vmem:[%s2983_s23 + $0x78] sm:$0xff] }
  0x41   : > { %673 = vperm.xlu0 %2707, %v274_v35  }
  0x45   : > { %683 = vperm.xlu0 %2707, %v276_v36  }
  0x8e   : > { %v2955_v37 = vpop.permute.xlu1 %360  ;;  %v2957_v38 = vpop.permute.xlu0 %355 }
  0x92   : > { %v2959_v39 = vpop.permute.xlu1 %365  ;;  %v2965_v41 = vpop.permute.xlu0 %2710 }
  0x93   : > { %4818 = vst [vmem:[#allocation2_spill] sm:$0xff] %v2959_v39 }
  0x96   : > { %v2961_v40 = vpop.permute.xlu1 %370 }
  0x97   : > { %4819 = vst [vmem:[#allocation3_spill] sm:$0xff] %v2961_v40 }
  0x9a   : > { %v2971_v42 = vpop.permute.xlu1 %380 }
  0x9c   : > { %v2973_v43 = vpop.permute.xlu0 %375 }
  0x9e   : > { %v2976_v44 = vpop.permute.xlu1 %390 }
  0x9f   : > { %4820 = vst [vmem:[#allocation4_spill] sm:$0xff] %v2976_v44 }
  0xa0   : > { %v2978_v45 = vpop.permute.xlu0 %385 }
  0xa1   : > { %4821 = vst [vmem:[#allocation5_spill] sm:$0xff] %v2978_v45 }
  0xa2   : > { %v425_v50 = vpop.permute.xlu1 %424 }
  0xa3   : > { %v460_v53 = vmul.f32 0.0, %v425_v50  ;;  %v461_v56 = vmul.f32 %v425_v50, %v2998_v54  ;;  %v462_v57 = vmul.f32 %v425_v50, %v3001_v55 }
  0xa4   : > { %v420_v46 = vpop.permute.xlu0 %419 }
  0xa5   : > { %v457_v48 = vmul.f32 0.0, %v420_v46  ;;  %v458_v49 = vmul.f32 %v420_v46, %v2986_v47  ;;  %v459_v52 = vmul.f32 %v420_v46, %v2992_v51 }
  0xa6   : > { %v435_v62 = vpop.permute.xlu1 %434 }
  0xa7   : > { %505 = vrot.lane.b32.xlu0 %v457_v48, %s2827_s24  ;;  %507 = vrot.lane.b32.xlu1 %v458_v49, %s2827_s24  ;;  %v466_v1 = vmul.f32 0.0, %v435_v62  ;;  %v467_v4 = vmul.f32 %v435_v62, %v3020_v2  ;;  %v468_v5 = vmul.f32 %v435_v62, %v3023_v3 }
  0xa8   : > { %v430_v58 = vpop.permute.xlu0 %429 }
  0xa9   : > { %v463_v60 = vmul.f32 0.0, %v430_v58  ;;  %v464_v61 = vmul.f32 %v430_v58, %v3008_v59  ;;  %v465_v0 = vmul.f32 %v430_v58, %v3014_v63 }
  0xaa   : > { %v445_v11 = vpop.permute.xlu1 %444 }
  0xab   : > { %509 = vrot.lane.b32.xlu0 %v459_v52, %s2827_s24  ;;  %511 = vrot.lane.b32.xlu1 %v460_v53, %s2827_s24  ;;  %v472_v16 = vmul.f32 0.0, %v445_v11  ;;  %v473_v19 = vmul.f32 %v445_v11, %v3042_v17  ;;  %v474_v20 = vmul.f32 %v445_v11, %v3045_v18 }
  0xac   : > { %v440_v7 = vpop.permute.xlu0 %439 }
  0xad   : > { %v469_v9 = vmul.f32 0.0, %v440_v7  ;;  %v470_v10 = vmul.f32 %v440_v7, %v3030_v8  ;;  %v471_v15 = vmul.f32 %v440_v7, %v3036_v12 }
  0xae   : > { %v455_v25 = vpop.permute.xlu1 %454 }
  0xaf   : > { %513 = vrot.lane.b32.xlu0 %v461_v56, %s2827_s24  ;;  %515 = vrot.lane.b32.xlu1 %v462_v57, %s2827_s24  ;;  %v478_v31 = vmul.f32 0.0, %v455_v25  ;;  %v479_v36 = vmul.f32 %v455_v25, %v3069_v33  ;;  %v480_v46 = vmul.f32 %v455_v25, %v3072_v34 }
  0xb0   : > { %v450_v14 = vpop.permute.xlu0 %449 }
  0xb1   : > { %v475_v23 = vmul.f32 0.0, %v450_v14  ;;  %v476_v24 = vmul.f32 %v450_v14, %v3052_v22  ;;  %v477_v30 = vmul.f32 %v450_v14, %v3060_v28 }
  0xb2   : > { %v649_v49 = vpop.permute.xlu1 %648 }
  0xb3   : > { %517 = vrot.lane.b32.xlu0 %v463_v60, %s2827_s24  ;;  %519 = vrot.lane.b32.xlu1 %v464_v61, %s2827_s24 }
  0xb4   : > { %v2716_v21 = vpop.permute.xlu0 %2715 }
  0xb5   : > { %v3055_v26 = vunpack.i.h.bf16 %v2716_v21  ;;  %v2717_v27 = vunpack.i.l.bf16 %v2716_v21 }
  0xb7   : > { %521 = vrot.lane.b32.xlu0 %v465_v0, %s2827_s24  ;;  %523 = vrot.lane.b32.xlu1 %v466_v1, %s2827_s24  ;;  %v3064_v32 = vsel %vm624_vm4, %v2717_v27, %v3055_v26  ;;  %v3074_v35 = vmul.f32 0.0, %v2717_v27  ;;  %v631_v53 = vmul.f32 %v3055_v26, %v2992_v51  ;;  %v633_v60 = vmul.f32 %v3055_v26, %v3001_v55 }
  0xb8   : > { %v630_v48 = vmul.f32 %v3064_v32, %v2986_v47  ;;  %v654_v56 = vpop.permute.xlu0 %653  ;;  %v632_v61 = vmul.f32 %v3064_v32, %v2998_v54  ;;  %v634_v1 = vmul.f32 %v3064_v32, %v3008_v59  ;;  %v638_v21 = vmul.f32 %v3064_v32, %v3030_v8 }
  0xb9   : > { %v686_v52 = vmul.f32 %v649_v49, %v3074_v35  ;;  %v689_v57 = vmul.f32 %v654_v56, %v3074_v35  ;;  %v688_v58 = vmul.f32 %v649_v49, %v631_v53  ;;  %v691_v62 = vmul.f32 %v654_v56, %v633_v60 }
  0xba   : > { %v687_v50 = vmul.f32 %v649_v49, %v630_v48  ;;  %v690_v0 = vmul.f32 %v654_v56, %v632_v61  ;;  %v639_v27 = vmul.f32 %v3055_v26, %v3036_v12  ;;  %v640_v48 = vmul.f32 %v3064_v32, %v3042_v17 }
  0xbb   : > { %525 = vrot.lane.b32.xlu0 %v467_v4, %s2827_s24  ;;  %527 = vrot.lane.b32.xlu1 %v468_v5, %s2827_s24  ;;  %v659_v4 = vpop.permute.xlu1 %658 }
  0xbc   : > { %v693_v5 = vmul.f32 %v659_v4, %v634_v1  ;;  %v692_v7 = vmul.f32 %v659_v4, %v3074_v35  ;;  %v644_v1 = vmul.f32 %v3064_v32, %v3069_v33 }
  0xbf   : > { %529 = vrot.lane.b32.xlu0 %v469_v9, %s2827_s24  ;;  %531 = vrot.lane.b32.xlu1 %v470_v10, %s2827_s24  ;;  %v635_v9 = vmul.f32 %v3055_v26, %v3014_v63  ;;  %v664_v10 = vpop.permute.xlu0 %663 }
  0xc0   : > { %v695_v11 = vmul.f32 %v664_v10, %v3074_v35 }
  0xc1   : > { %v694_v14 = vmul.f32 %v659_v4, %v635_v9  ;;  %v280_v9 = vld [vmem:[%s4753_s1 + $0xd8] sm:$0xff] }
  0xc3   : > { %533 = vrot.lane.b32.xlu0 %v471_v15, %s2827_s24  ;;  %535 = vrot.lane.b32.xlu1 %v472_v16, %s2827_s24  ;;  %v637_v15 = vmul.f32 %v3055_v26, %v3023_v3  ;;  %v636_v16 = vmul.f32 %v3064_v32, %v3020_v2 }
  0xc7   : > { %537 = vrot.lane.b32.xlu0 %v473_v19, %s2827_s24  ;;  %539 = vrot.lane.b32.xlu1 %v474_v20, %s2827_s24  ;;  %v697_v19 = vmul.f32 %v664_v10, %v637_v15  ;;  %v696_v20 = vmul.f32 %v664_v10, %v636_v16  ;;  %v283_v10 = vld [vmem:[%s4753_s1 + $0xf0] sm:$0xff] }
  0xcb   : > { %541 = vrot.lane.b32.xlu0 %v475_v23, %s2827_s24  ;;  %543 = vrot.lane.b32.xlu1 %v476_v24, %s2827_s24  ;;  %v669_v23 = vpop.permute.xlu1 %668 }
  0xcc   : > { %v699_v24 = vmul.f32 %v669_v23, %v638_v21  ;;  %v698_v25 = vmul.f32 %v669_v23, %v3074_v35 }
  0xcf   : > { %545 = vrot.lane.b32.xlu0 %v477_v30, %s2827_s24  ;;  %547 = vrot.lane.b32.xlu1 %v478_v31, %s2827_s24  ;;  %v674_v30 = vpop.permute.xlu0 %673  ;;  %v679_v53 = vpop.permute.xlu1 %678 }
  0xd0   : > { %v701_v31 = vmul.f32 %v674_v30, %v3074_v35 }
  0xd3   : > { %549 = vrot.lane.b32.xlu0 %v479_v36, %s2827_s24  ;;  %551 = vrot.lane.b32.xlu1 %v480_v46, %s2827_s24  ;;  %v700_v36 = vmul.f32 %v669_v23, %v639_v27  ;;  %v641_v46 = vmul.f32 %v3055_v26, %v3045_v18  ;;  %v684_v60 = vpop.permute.xlu0 %683 }
  0xd4   : > { %v707_v61 = vmul.f32 %v684_v60, %v3074_v35 }
  0xd5   : > { %v703_v49 = vmul.f32 %v674_v30, %v641_v46 }
  0xd7   : > { %736 = vrot.lane.b32.xlu0 %v687_v50, %s2828_s25  ;;  %734 = vrot.lane.b32.xlu1 %v686_v52, %s2828_s25  ;;  %v702_v50 = vmul.f32 %v674_v30, %v640_v48  ;;  %v642_v52 = vmul.f32 %v3064_v32, %v3052_v22  ;;  %v278_v32 = vld [vmem:[%s4753_s1 + $0xc8] sm:$0xff] }
  0xd9   : > { %v705_v56 = vmul.f32 %v679_v53, %v642_v52 }
  0xdb   : > { %740 = vrot.lane.b32.xlu0 %v689_v57, %s2828_s25  ;;  %738 = vrot.lane.b32.xlu1 %v688_v58, %s2828_s25  ;;  %v704_v57 = vmul.f32 %v679_v53, %v3074_v35  ;;  %v643_v58 = vmul.f32 %v3055_v26, %v3060_v28  ;;  %v277_v35 = vld [vmem:[%s4753_s1 + $0xc0] sm:$0xff] }
  0xdf   : > { %744 = vrot.lane.b32.xlu0 %v691_v62, %s2828_s25  ;;  %742 = vrot.lane.b32.xlu1 %v690_v0, %s2828_s25  ;;  %v706_v62 = vmul.f32 %v679_v53, %v643_v58  ;;  %v645_v0 = vmul.f32 %v3055_v26, %v3072_v34  ;;  %v279_v26 = vld [vmem:[%s4753_s1 + $0xd0] sm:$0xff] }
  0xe1   : > { %v709_v4 = vmul.f32 %v684_v60, %v645_v0 }
  0xe3   : > { %748 = vrot.lane.b32.xlu0 %v693_v5, %s2828_s25  ;;  %746 = vrot.lane.b32.xlu1 %v692_v7, %s2828_s25  ;;  %v708_v5 = vmul.f32 %v684_v60, %v644_v1  ;;  %v281_v7 = vld [vmem:[%s4753_s1 + $0xe0] sm:$0xff] }
  0xe7   : > { %752 = vrot.lane.b32.xlu0 %v695_v11, %s2828_s25  ;;  %750 = vrot.lane.b32.xlu1 %v694_v14, %s2828_s25  ;;  %v282_v11 = vld [vmem:[%s4753_s1 + $0xe8] sm:$0xff]  ;;  %v284_v14 = vld [vmem:[%s4753_s1 + $0xf8] sm:$0xff] }
  0xeb   : > { %756 = vrot.lane.b32.xlu0 %v697_v19, %s2828_s25  ;;  %754 = vrot.lane.b32.xlu1 %v696_v20, %s2828_s25 }
  0xef   : > { %760 = vrot.lane.b32.xlu0 %v699_v24, %s2828_s25  ;;  %758 = vrot.lane.b32.xlu1 %v698_v25, %s2828_s25 }
  0xf3   : > { %764 = vrot.lane.b32.xlu0 %v701_v31, %s2828_s25  ;;  %762 = vrot.lane.b32.xlu1 %v700_v36, %s2828_s25 }
  0xf7   : > { %768 = vrot.lane.b32.xlu0 %v703_v49, %s2828_s25  ;;  %766 = vrot.lane.b32.xlu1 %v702_v50, %s2828_s25 }
  0xfb   : > { %772 = vrot.lane.b32.xlu0 %v705_v56, %s2828_s25  ;;  %770 = vrot.lane.b32.xlu1 %v704_v57, %s2828_s25 }
  0xff   : > { %776 = vrot.lane.b32.xlu0 %v707_v61, %s2828_s25  ;;  %774 = vrot.lane.b32.xlu1 %v706_v62, %s2828_s25 }
 0x103   : > { %780 = vrot.lane.b32.xlu0 %v709_v4, %s2828_s25  ;;  %778 = vrot.lane.b32.xlu1 %v708_v5, %s2828_s25 }
 0x107   : > { %874 = vperm.xlu0 %2707, %v277_v35   ;;  %2720 = vrot.lane.b32.xlu1 %v2886_v13, %s2827_s24 }
 0x10b   : > { %884 = vperm.xlu0 %2707, %v279_v26   ;;  %879 = vperm.xlu1 %2708, %v278_v32  }
 0x10f   : > { %894 = vperm.xlu0 %2707, %v281_v7   ;;  %889 = vperm.xlu1 %2708, %v280_v9   ;;  %v2712_v9 = vunpack.i.l.bf16 %v2965_v41 }
 0x111   : > { %v3230_v6 = vmul.f32 0.0, %v2712_v9 }
 0x113   : > { %904 = vperm.xlu0 %2707, %v283_v10   ;;  %899 = vperm.xlu1 %2708, %v282_v11  }
 0x117   : > { %909 = vperm.xlu1 %2708, %v284_v14   ;;  %v3228_v14 = vunpack.i.h.bf16 %v2965_v41 }
 0x119   : > { %v3170_v15 = vpop.permute.xlu0 %505  ;;  %v3172_v16 = vpop.permute.xlu1 %507 }
 0x11d   : > { %v3174_v19 = vpop.permute.xlu0 %509  ;;  %v3176_v20 = vpop.permute.xlu1 %511 }
 0x121   : > { %v3178_v21 = vpop.permute.xlu0 %513  ;;  %v3180_v23 = vpop.permute.xlu1 %515 }
 0x125   : > { %v3182_v24 = vpop.permute.xlu0 %517  ;;  %v3184_v25 = vpop.permute.xlu1 %519 }
 0x126   : > { %4822 = vst [vmem:[#allocation6_spill] sm:$0xff] %v3182_v24  ;;  %4823 = vst [vmem:[#allocation7_spill] sm:$0xff] %v3184_v25 }
 0x129   : > { %v3186_v27 = vpop.permute.xlu0 %521  ;;  %v3188_v30 = vpop.permute.xlu1 %523 }
 0x12a   : > { %4824 = vst [vmem:[#allocation8_spill] sm:$0xff] %v3186_v27  ;;  %4825 = vst [vmem:[#allocation9_spill] sm:$0xff] %v3188_v30 }
 0x12d   : > { %v3190_v31 = vpop.permute.xlu0 %525  ;;  %v3192_v36 = vpop.permute.xlu1 %527 }
 0x12e   : > { %4826 = vst [vmem:[#allocation10_spill] sm:$0xff] %v3190_v31  ;;  %4827 = vst [vmem:[#allocation11_spill] sm:$0xff] %v3192_v36 }
 0x131   : > { %v530_v46 = vpop.permute.xlu0 %529  ;;  %v532_v48 = vpop.permute.xlu1 %531 }
 0x132   : > { %v562_v31 = vsel %vm553_vm6, %v530_v46, %v532_v48 }
 0x135   : > { %v3194_v49 = vpop.permute.xlu0 %533  ;;  %v536_v50 = vpop.permute.xlu1 %535 }
 0x136   : > { %4828 = vst [vmem:[#allocation12_spill] sm:$0xff] %v3194_v49 }
 0x139   : > { %v538_v52 = vpop.permute.xlu0 %537  ;;  %v3196_v53 = vpop.permute.xlu1 %539 }
 0x13a   : > { %4829 = vst [vmem:[#allocation13_spill] sm:$0xff] %v3196_v53 }
 0x13d   : > { %v542_v56 = vpop.permute.xlu0 %541  ;;  %v544_v57 = vpop.permute.xlu1 %543 }
 0x141   : > { %v3198_v58 = vpop.permute.xlu0 %545  ;;  %v3200_v60 = vpop.permute.xlu1 %547 }
 0x142   : > { %4830 = vst [vmem:[#allocation14_spill] sm:$0xff] %v3198_v58 }
 0x145   : > { %v3202_v61 = vpop.permute.xlu0 %549  ;;  %v3204_v62 = vpop.permute.xlu1 %551 }
 0x146   : > { %4831 = vst [vmem:[#allocation15_spill] sm:$0xff] %v3204_v62 }
 0x149   : > { %v3206_v0 = vpop.permute.xlu0 %736  ;;  %v3208_v1 = vpop.permute.xlu1 %734 }
 0x14d   : > { %v3210_v4 = vpop.permute.xlu0 %740  ;;  %v3212_v5 = vpop.permute.xlu1 %738 }
 0x151   : > { %v3214_v35 = vpop.permute.xlu0 %744  ;;  %v3216_v26 = vpop.permute.xlu1 %742 }
 0x152   : > { %4832 = vst [vmem:[#allocation16_spill] sm:$0xff] %v3214_v35 }
 0x155   : > { %v3218_v32 = vpop.permute.xlu0 %748  ;;  %v3220_v7 = vpop.permute.xlu1 %746 }
 0x156   : > { %4833 = vst [vmem:[#allocation17_spill] sm:$0xff] %v3218_v32  ;;  %4834 = vst [vmem:[#allocation18_spill] sm:$0xff] %v3220_v7  ;;  %v3238_v7 = vsel %vm331_vm5, %v2712_v9, %v3228_v14 }
 0x157   : > { %v345_v41 = vmul.f32 %v3238_v7, %v3030_v8  ;;  %v347_v46 = vmul.f32 %v3238_v7, %v3042_v17 }
 0x159   : > { %v3223_v10 = vpop.permute.xlu0 %752  ;;  %v3225_v11 = vpop.permute.xlu1 %750  ;;  %v406_v9 = vmul.f32 %v2973_v43, %v345_v41 }
 0x15a   : > { %4835 = vst [vmem:[#allocation19_spill] sm:$0xff] %v3223_v10  ;;  %4836 = vst [vmem:[#allocation20_spill] sm:$0xff] %v3225_v11  ;;  %v405_v10 = vmul.f32 %v2973_v43, %v3230_v6 }
 0x15c   : > { %v606_v24 = vadd.f32 %v562_v31, %v405_v10  ;;  %v564_v31 = vsel %vm553_vm6, %v536_v50, %v538_v52  ;;  %v565_v10 = vsel %vm553_vm6, %v538_v52, %v3196_v53  ;;  %v566_v50 = vsel %vm553_vm6, %v542_v56, %v544_v57 }
 0x15d   : > { %v3232_v36 = vpop.permute.xlu0 %756  ;;  %v3234_v30 = vpop.permute.xlu1 %754  ;;  %v567_v56 = vsel %vm553_vm6, %v544_v57, %v3198_v58  ;;  %v569_v57 = vsel %vm553_vm6, %v3202_v61, %v3204_v62 }
 0x15e   : > { %4837 = vst [vmem:[#allocation21_spill] sm:$0xff] %v3232_v36  ;;  %4838 = vst [vmem:[#allocation22_spill] sm:$0xff] %v3234_v30  ;;  %v563_v36 = vsel %vm553_vm6, %v532_v48, %v3194_v49 }
 0x15f   : > { %v607_v39 = vadd.f32 %v563_v36, %v406_v9 }
 0x161   : > { %v761_v32 = vpop.permute.xlu0 %760  ;;  %v759_v11 = vpop.permute.xlu1 %758 }
 0x162   : > { %v791_v30 = vsel %vm782_vm7, %v759_v11, %v761_v32  ;;  %v408_v11 = vmul.f32 %v2971_v42, %v3230_v6 }
 0x163   : > { %v3249_v40 = vadd.f32 %v791_v30, %v606_v24  ;;  %v409_v24 = vmul.f32 %v2971_v42, %v347_v46 }
 0x164   : > { %v609_v41 = vadd.f32 %v564_v31, %v408_v11 }
 0x165   : > { %v765_v25 = vpop.permute.xlu0 %764  ;;  %v3253_v27 = vpop.permute.xlu1 %762  ;;  %v610_v36 = vadd.f32 %v565_v10, %v409_v24 }
 0x166   : > { %4839 = vst [vmem:[#allocation23_spill] sm:$0xff] %v3253_v27  ;;  %v792_v48 = vsel %vm782_vm7, %v761_v32, %v3253_v27  ;;  %v411_v32 = vmul.f32 %v2978_v45, %v3230_v6 }
 0x167   : > { %v3263_v30 = vadd.f32 %v792_v48, %v607_v39  ;;  %v349_v39 = vmul.f32 %v3238_v7, %v3052_v22 }
 0x168   : > { %v612_v31 = vadd.f32 %v566_v50, %v411_v32  ;;  %v568_v50 = vsel %vm553_vm6, %v3200_v60, %v3202_v61  ;;  %v414_v32 = vmul.f32 %v2976_v44, %v3230_v6 }
 0x169   : > { %v3265_v9 = vpop.permute.xlu0 %768  ;;  %v767_v49 = vpop.permute.xlu1 %766 }
 0x16a   : > { %4840 = vst [vmem:[#allocation24_spill] sm:$0xff] %v3265_v9  ;;  %v793_v35 = vsel %vm782_vm7, %v765_v25, %v767_v49  ;;  %v794_v52 = vsel %vm782_vm7, %v767_v49, %v3265_v9  ;;  %v412_v49 = vmul.f32 %v2978_v45, %v349_v39 }
 0x16b   : > { %v3273_v27 = vadd.f32 %v793_v35, %v609_v41  ;;  %v3275_v46 = vadd.f32 %v794_v52, %v610_v36  ;;  %v351_v35 = vmul.f32 %v3238_v7, %v3069_v33 }
 0x16c   : > { %v613_v24 = vadd.f32 %v567_v56, %v412_v49 }
 0x16d   : > { %v773_v10 = vpop.permute.xlu0 %772  ;;  %v771_v48 = vpop.permute.xlu1 %770  ;;  %v415_v39 = vmul.f32 %v2976_v44, %v351_v35  ;;  %v3654_v44 = vld [vmem:[%s2983_s23 + $0x18] sm:$0xff] }
 0x16e   : > { %v795_v25 = vsel %vm782_vm7, %v771_v48, %v773_v10  ;;  %v615_v48 = vadd.f32 %v568_v50, %v414_v32 }
 0x16f   : > { %v3283_v11 = vadd.f32 %v795_v25, %v612_v31  ;;  %v616_v56 = vadd.f32 %v569_v57, %v415_v39 }
 0x171   : > { %v777_v41 = vpop.permute.xlu0 %776  ;;  %v3287_v36 = vpop.permute.xlu1 %774 }
 0x172   : > { %4841 = vst [vmem:[#allocation25_spill] sm:$0xff] %v3287_v36  ;;  %v796_v52 = vsel %vm782_vm7, %v773_v10, %v3287_v36 }
 0x173   : > { %v3300_v31 = vadd.f32 %v796_v52, %v613_v24 }
 0x175   : > { %v3302_v25 = vpop.permute.xlu0 %780  ;;  %v779_v49 = vpop.permute.xlu1 %778 }
 0x176   : > { %4842 = vst [vmem:[#allocation26_spill] sm:$0xff] %v3302_v25  ;;  %v797_v60 = vsel %vm782_vm7, %v777_v41, %v779_v49  ;;  %v798_v61 = vsel %vm782_vm7, %v779_v49, %v3302_v25 }
 0x177   : > { %v3307_v62 = vadd.f32 %v797_v60, %v615_v48  ;;  %v3309_v10 = vadd.f32 %v798_v61, %v616_v56 }
 0x179   : > { %v2721_v36 = vpop.permute.xlu1 %2720 }
 0x17a   : > { %v3311_v58 = vunpack.i.h.bf16 %v2721_v36  ;;  %v2722_v35 = vunpack.i.l.bf16 %v2721_v36 }
 0x17c   : > { %v3315_v24 = vsel %vm553_vm6, %v2722_v35, %v3311_v58  ;;  %v3317_v50 = vmul.f32 0.0, %v2722_v35  ;;  %v857_v36 = vmul.f32 %v3311_v58, %v2992_v51  ;;  %v859_v60 = vmul.f32 %v3311_v58, %v3001_v55 }
 0x17d   : > { %v856_v41 = vmul.f32 %v3315_v24, %v2986_v47  ;;  %v858_v49 = vmul.f32 %v3315_v24, %v2998_v54 }
 0x186   : > { %v875_v57 = vpop.permute.xlu0 %874 }
 0x187   : > { %v912_v52 = vmul.f32 %v875_v57, %v3317_v50  ;;  %v913_v32 = vmul.f32 %v875_v57, %v856_v41  ;;  %v914_v48 = vmul.f32 %v875_v57, %v857_v36  ;;  %v860_v57 = vmul.f32 %v3315_v24, %v3008_v59 }
 0x189   : > { %960 = vrot.lane.b32.xlu0 %v912_v52, %s2829_s19  ;;  %962 = vrot.lane.b32.xlu1 %v913_v32, %s2829_s19 }
 0x18a   : > { %v880_v39 = vpop.permute.xlu1 %879  ;;  %v885_v41 = vpop.permute.xlu0 %884 }
 0x18b   : > { %v915_v56 = vmul.f32 %v880_v39, %v3317_v50  ;;  %v916_v61 = vmul.f32 %v880_v39, %v858_v49  ;;  %v917_v35 = vmul.f32 %v880_v39, %v859_v60  ;;  %v918_v52 = vmul.f32 %v885_v41, %v3317_v50 }
 0x18c   : > { %v919_v32 = vmul.f32 %v885_v41, %v860_v57  ;;  %v862_v49 = vmul.f32 %v3315_v24, %v3020_v2  ;;  %v863_v60 = vmul.f32 %v3311_v58, %v3023_v3 }
 0x18d   : > { %964 = vrot.lane.b32.xlu0 %v914_v48, %s2829_s19  ;;  %966 = vrot.lane.b32.xlu1 %v915_v56, %s2829_s19  ;;  %v861_v48 = vmul.f32 %v3311_v58, %v3014_v63 }
 0x18e   : > { %v890_v36 = vpop.permute.xlu1 %889  ;;  %v895_v57 = vpop.permute.xlu0 %894 }
 0x18f   : > { %v920_v39 = vmul.f32 %v885_v41, %v861_v48  ;;  %v921_v56 = vmul.f32 %v890_v36, %v3317_v50  ;;  %v864_v41 = vmul.f32 %v3315_v24, %v3030_v8 }
 0x191   : > { %968 = vrot.lane.b32.xlu0 %v916_v61, %s2829_s19  ;;  %970 = vrot.lane.b32.xlu1 %v917_v35, %s2829_s19  ;;  %v922_v61 = vmul.f32 %v890_v36, %v862_v49  ;;  %v923_v35 = vmul.f32 %v890_v36, %v863_v60  ;;  %v866_v49 = vmul.f32 %v3315_v24, %v3042_v17 }
 0x192   : > { %v900_v48 = vpop.permute.xlu1 %899  ;;  %v867_v60 = vmul.f32 %v3311_v58, %v3045_v18  ;;  %v869_v18 = vmul.f32 %v3311_v58, %v3060_v28  ;;  %v285_v28 = vld [vmem:[%s4753_s1 + $0x100] sm:$0xff] }
 0x193   : > { %v927_v36 = vmul.f32 %v900_v48, %v3317_v50 }
 0x195   : > { %972 = vrot.lane.b32.xlu0 %v918_v52, %s2829_s19  ;;  %974 = vrot.lane.b32.xlu1 %v919_v32, %s2829_s19  ;;  %v924_v52 = vmul.f32 %v895_v57, %v3317_v50  ;;  %v925_v32 = vmul.f32 %v895_v57, %v864_v41  ;;  %v905_v41 = vpop.permute.xlu0 %904 }
 0x199   : > { %976 = vrot.lane.b32.xlu0 %v920_v39, %s2829_s19  ;;  %978 = vrot.lane.b32.xlu1 %v921_v56, %s2829_s19  ;;  %v865_v39 = vmul.f32 %v3311_v58, %v3036_v12 }
 0x19b   : > { %v926_v56 = vmul.f32 %v895_v57, %v865_v39  ;;  %v930_v57 = vmul.f32 %v905_v41, %v3317_v50  ;;  %v910_v39 = vpop.permute.xlu1 %909 }
 0x19d   : > { %980 = vrot.lane.b32.xlu0 %v922_v61, %s2829_s19  ;;  %982 = vrot.lane.b32.xlu1 %v923_v35, %s2829_s19  ;;  %v928_v61 = vmul.f32 %v900_v48, %v866_v49  ;;  %v929_v35 = vmul.f32 %v900_v48, %v867_v60  ;;  %v932_v48 = vmul.f32 %v905_v41, %v869_v18 }
 0x1a1   : > { %984 = vrot.lane.b32.xlu0 %v924_v52, %s2829_s19  ;;  %986 = vrot.lane.b32.xlu1 %v925_v32, %s2829_s19  ;;  %v868_v52 = vmul.f32 %v3315_v24, %v3052_v22  ;;  %v870_v22 = vmul.f32 %v3315_v24, %v3069_v33  ;;  %v286_v33 = vld [vmem:[%s4753_s1 + $0x108] sm:$0xff]  ;;  %v289_v24 = vld [vmem:[%s4753_s1 + $0x120] sm:$0xff] }
 0x1a3   : > { %v931_v32 = vmul.f32 %v905_v41, %v868_v52  ;;  %v934_v49 = vmul.f32 %v910_v39, %v870_v22 }
 0x1a5   : > { %988 = vrot.lane.b32.xlu0 %v926_v56, %s2829_s19  ;;  %990 = vrot.lane.b32.xlu1 %v927_v36, %s2829_s19  ;;  %v933_v36 = vmul.f32 %v910_v39, %v3317_v50  ;;  %v871_v56 = vmul.f32 %v3311_v58, %v3072_v34  ;;  %v287_v34 = vld [vmem:[%s4753_s1 + $0x110] sm:$0xff]  ;;  %v288_v58 = vld [vmem:[%s4753_s1 + $0x118] sm:$0xff] }
 0x1a6   : > { %v290_v50 = vld [vmem:[%s4753_s1 + $0x128] sm:$0xff] }
 0x1a7   : > { %v935_v60 = vmul.f32 %v910_v39, %v871_v56 }
 0x1a9   : > { %992 = vrot.lane.b32.xlu0 %v928_v61, %s2829_s19  ;;  %994 = vrot.lane.b32.xlu1 %v929_v35, %s2829_s19  ;;  %v291_v61 = vld [vmem:[%s4753_s1 + $0x130] sm:$0xff]  ;;  %v292_v35 = vld [vmem:[%s4753_s1 + $0x138] sm:$0xff] }
 0x1ad   : > { %996 = vrot.lane.b32.xlu0 %v930_v57, %s2829_s19  ;;  %998 = vrot.lane.b32.xlu1 %v931_v32, %s2829_s19 }
 0x1b1   : > { %1000 = vrot.lane.b32.xlu0 %v932_v48, %s2829_s19  ;;  %1002 = vrot.lane.b32.xlu1 %v933_v36, %s2829_s19 }
 0x1b5   : > { %1004 = vrot.lane.b32.xlu0 %v934_v49, %s2829_s19  ;;  %1006 = vrot.lane.b32.xlu1 %v935_v60, %s2829_s19  ;;  %s2836_s19 = smov 94  }
 0x1b9   : > { %1075 = vperm.xlu0 %2707, %v285_v28   ;;  %1080 = vperm.xlu1 %2708, %v286_v33  }
 0x1bd   : > { %1085 = vperm.xlu0 %2707, %v287_v34   ;;  %1090 = vperm.xlu1 %2708, %v288_v58  }
 0x1c1   : > { %1095 = vperm.xlu0 %2707, %v289_v24   ;;  %1100 = vperm.xlu1 %2708, %v290_v50  }
 0x1c5   : > { %1105 = vperm.xlu0 %2707, %v291_v61   ;;  %1110 = vperm.xlu1 %2708, %v292_v35  }
 0x1fb   : > { %v3407_v41 = vpop.permute.xlu0 %960  ;;  %v3409_v52 = vpop.permute.xlu1 %962 }
 0x1fc   : > { %4843 = vst [vmem:[#allocation27_spill] sm:$0xff] %v3407_v41  ;;  %4844 = vst [vmem:[#allocation28_spill] sm:$0xff] %v3409_v52 }
 0x1ff   : > { %v3411_v57 = vpop.permute.xlu0 %964  ;;  %v3413_v32 = vpop.permute.xlu1 %966 }
 0x200   : > { %4845 = vst [vmem:[#allocation29_spill] sm:$0xff] %v3411_v57  ;;  %4846 = vst [vmem:[#allocation30_spill] sm:$0xff] %v3413_v32 }
 0x203   : > { %v3415_v39 = vpop.permute.xlu0 %968  ;;  %v3417_v18 = vpop.permute.xlu1 %970 }
 0x204   : > { %4847 = vst [vmem:[#allocation31_spill] sm:$0xff] %v3415_v39  ;;  %4848 = vst [vmem:[#allocation32_spill] sm:$0xff] %v3417_v18 }
 0x207   : > { %v3419_v48 = vpop.permute.xlu0 %972  ;;  %v3421_v36 = vpop.permute.xlu1 %974 }
 0x208   : > { %4849 = vst [vmem:[#allocation33_spill] sm:$0xff] %v3419_v48  ;;  %4850 = vst [vmem:[#allocation34_spill] sm:$0xff] %v3421_v36 }
 0x20b   : > { %v3423_v22 = vpop.permute.xlu0 %976  ;;  %v3425_v56 = vpop.permute.xlu1 %978 }
 0x20c   : > { %4851 = vst [vmem:[#allocation35_spill] sm:$0xff] %v3423_v22  ;;  %4852 = vst [vmem:[#allocation36_spill] sm:$0xff] %v3425_v56 }
 0x20f   : > { %v3427_v49 = vpop.permute.xlu0 %980  ;;  %v3429_v60 = vpop.permute.xlu1 %982 }
 0x210   : > { %4853 = vst [vmem:[#allocation37_spill] sm:$0xff] %v3427_v49  ;;  %4854 = vst [vmem:[#allocation38_spill] sm:$0xff] %v3429_v60 }
 0x213   : > { %v985_v28 = vpop.permute.xlu0 %984  ;;  %v987_v33 = vpop.permute.xlu1 %986 }
 0x214   : > { %v1017_v34 = vsel %vm1008_vm8, %v985_v28, %v987_v33 }
 0x215   : > { %v3433_v58 = vadd.f32 %v1017_v34, %v3249_v40 }
 0x217   : > { %4855 = vst [vmem:[#allocation39_spill] sm:$0xff] %v3433_v58  ;;  %v3435_v24 = vpop.permute.xlu0 %988  ;;  %v991_v50 = vpop.permute.xlu1 %990  ;;  %v3697_v58 = vld [vmem:[%s2983_s23 + $0x30] sm:$0xff] }
 0x218   : > { %4856 = vst [vmem:[#allocation40_spill] sm:$0xff] %v3435_v24  ;;  %v1018_v61 = vsel %vm1008_vm8, %v987_v33, %v3435_v24  ;;  %4880 = vst [vmem:[#allocation64_spill] sm:$0xff] %v3697_v58 }
 0x219   : > { %v3440_v35 = vadd.f32 %v1018_v61, %v3263_v30 }
 0x21b   : > { %4857 = vst [vmem:[#allocation41_spill] sm:$0xff] %v3440_v35  ;;  %v993_v48 = vpop.permute.xlu0 %992  ;;  %v3442_v56 = vpop.permute.xlu1 %994 }
 0x21c   : > { %4858 = vst [vmem:[#allocation42_spill] sm:$0xff] %v3442_v56  ;;  %v1019_v60 = vsel %vm1008_vm8, %v991_v50, %v993_v48  ;;  %v1020_v28 = vsel %vm1008_vm8, %v993_v48, %v3442_v56 }
 0x21d   : > { %v3448_v40 = vadd.f32 %v1019_v60, %v3273_v27  ;;  %v3451_v34 = vadd.f32 %v1020_v28, %v3275_v46 }
 0x21f   : > { %4859 = vst [vmem:[#allocation43_spill] sm:$0xff] %v3448_v40  ;;  %4860 = vst [vmem:[#allocation44_spill] sm:$0xff] %v3451_v34  ;;  %v997_v49 = vpop.permute.xlu0 %996  ;;  %v999_v36 = vpop.permute.xlu1 %998 }
 0x220   : > { %v1021_v33 = vsel %vm1008_vm8, %v997_v49, %v999_v36 }
 0x221   : > { %v3455_v30 = vadd.f32 %v1021_v33, %v3283_v11 }
 0x223   : > { %4861 = vst [vmem:[#allocation45_spill] sm:$0xff] %v3455_v30  ;;  %v3457_v61 = vpop.permute.xlu0 %1000  ;;  %v1003_v22 = vpop.permute.xlu1 %1002 }
 0x224   : > { %4862 = vst [vmem:[#allocation46_spill] sm:$0xff] %v3457_v61  ;;  %v1022_v50 = vsel %vm1008_vm8, %v999_v36, %v3457_v61 }
 0x225   : > { %v3462_v48 = vadd.f32 %v1022_v50, %v3300_v31 }
 0x227   : > { %4863 = vst [vmem:[#allocation47_spill] sm:$0xff] %v3462_v48  ;;  %v1005_v27 = vpop.permute.xlu0 %1004  ;;  %v3464_v60 = vpop.permute.xlu1 %1006 }
 0x228   : > { %4864 = vst [vmem:[#allocation48_spill] sm:$0xff] %v3464_v60  ;;  %v1023_v46 = vsel %vm1008_vm8, %v1003_v22, %v1005_v27  ;;  %v1024_v49 = vsel %vm1008_vm8, %v1005_v27, %v3464_v60 }
 0x229   : > { %v3470_v11 = vadd.f32 %v1024_v49, %v3309_v10  ;;  %v3473_v28 = vadd.f32 %v1023_v46, %v3307_v62 }
 0x22b   : > { %4865 = vst [vmem:[#allocation49_spill] sm:$0xff] %v3470_v11  ;;  %4866 = vst [vmem:[#allocation50_spill] sm:$0xff] %v3473_v28  ;;  %v3644_v28 = vld [vmem:[%s2983_s23 + $0x10] sm:$0xff] }
 0x238   : > { %v1076_v33 = vpop.permute.xlu0 %1075  ;;  %v1081_v50 = vpop.permute.xlu1 %1080 }
 0x239   : > { %v1113_v36 = vmul.f32 %v1076_v33, %v2986_v47  ;;  %v1114_v31 = vmul.f32 %v1076_v33, %v2992_v51  ;;  %v1115_v22 = vmul.f32 %v1081_v50, %v2998_v54  ;;  %v1116_v27 = vmul.f32 %v1081_v50, %v3001_v55  ;;  %v310_v33 = vld [vmem:[%s4753_s1 + $0x1c8] sm:$0xff]  ;;  %v317_v50 = vld [vmem:[%s4753_s1 + $0x200] sm:$0xff] }
 0x23b   : > { %1145 = vrot.lane.b32.xlu0 %v1113_v36, %s2825_s27  ;;  %1147 = vrot.lane.b32.xlu1 %v1114_v31, %s2825_s27  ;;  %v309_v36 = vld [vmem:[%s4753_s1 + $0x1c0] sm:$0xff]  ;;  %v303_v31 = vld [vmem:[%s4753_s1 + $0x190] sm:$0xff] }
 0x23c   : > { %v1086_v60 = vpop.permute.xlu0 %1085  ;;  %v1091_v10 = vpop.permute.xlu1 %1090 }
 0x23d   : > { %v1117_v62 = vmul.f32 %v1086_v60, %v3008_v59  ;;  %v1118_v47 = vmul.f32 %v1086_v60, %v3014_v63  ;;  %v1119_v51 = vmul.f32 %v1091_v10, %v3020_v2  ;;  %v1120_v54 = vmul.f32 %v1091_v10, %v3023_v3  ;;  %v293_v63 = vld [vmem:[%s4753_s1 + $0x140] sm:$0xff]  ;;  %v295_v60 = vld [vmem:[%s4753_s1 + $0x150] sm:$0xff] }
 0x23e   : > { %v301_v3 = vld [vmem:[%s4753_s1 + $0x180] sm:$0xff] }
 0x23f   : > { %1151 = vrot.lane.b32.xlu1 %v1116_v27, %s2825_s27  ;;  %1149 = vrot.lane.b32.xlu0 %v1115_v22, %s2825_s27  ;;  %v304_v22 = vld [vmem:[%s4753_s1 + $0x198] sm:$0xff]  ;;  %v297_v27 = vld [vmem:[%s4753_s1 + $0x160] sm:$0xff] }
 0x240   : > { %v1096_v46 = vpop.permute.xlu0 %1095  ;;  %v3493_v49 = vpop.permute.xlu1 %1100  ;;  %v305_v10 = vld [vmem:[%s4753_s1 + $0x1a0] sm:$0xff] }
 0x241   : > { %v1121_v55 = vmul.f32 %v1096_v46, %v3030_v8  ;;  %v1122_v59 = vmul.f32 %v1096_v46, %v3036_v12  ;;  %v1123_v2 = vmul.f32 %v3493_v49, %v3042_v17  ;;  %v294_v8 = vld [vmem:[%s4753_s1 + $0x148] sm:$0xff]  ;;  %v296_v17 = vld [vmem:[%s4753_s1 + $0x158] sm:$0xff] }
 0x242   : > { %v302_v12 = vld [vmem:[%s4753_s1 + $0x188] sm:$0xff]  ;;  %v320_v46 = vld [vmem:[%s4753_s1 + $0x218] sm:$0xff] }
 0x243   : > { %1155 = vrot.lane.b32.xlu1 %v1118_v47, %s2825_s27  ;;  %1153 = vrot.lane.b32.xlu0 %v1117_v62, %s2825_s27  ;;  %v318_v62 = vld [vmem:[%s4753_s1 + $0x208] sm:$0xff] }
 0x244   : > { %v298_v47 = vld [vmem:[%s4753_s1 + $0x168] sm:$0xff] }
 0x247   : > { %1159 = vrot.lane.b32.xlu1 %v1120_v54, %s2825_s27  ;;  %1157 = vrot.lane.b32.xlu0 %v1119_v51, %s2825_s27  ;;  %v312_v51 = vld [vmem:[%s4753_s1 + $0x1d8] sm:$0xff]  ;;  %v306_v54 = vld [vmem:[%s4753_s1 + $0x1a8] sm:$0xff] }
 0x24b   : > { %1163 = vrot.lane.b32.xlu1 %v1122_v59, %s2825_s27  ;;  %1161 = vrot.lane.b32.xlu0 %v1121_v55, %s2825_s27  ;;  %v319_v55 = vld [vmem:[%s4753_s1 + $0x210] sm:$0xff]  ;;  %v300_v59 = vld [vmem:[%s4753_s1 + $0x178] sm:$0xff] }
 0x24f   : > { %1261 = vperm.xlu1 %2708, %v293_v63   ;;  %1165 = vrot.lane.b32.xlu0 %v1123_v2, %s2825_s27  ;;  %v299_v63 = vld [vmem:[%s4753_s1 + $0x170] sm:$0xff]  ;;  %v313_v2 = vld [vmem:[%s4753_s1 + $0x1e0] sm:$0xff] }
 0x253   : > { %1488 = vperm.xlu1 %2708, %v301_v3   ;;  %1266 = vperm.xlu0 %2707, %v294_v8   ;;  %v308_v3 = vld [vmem:[%s4753_s1 + $0x1b8] sm:$0xff]  ;;  %v307_v8 = vld [vmem:[%s4753_s1 + $0x1b0] sm:$0xff] }
 0x257   : > { %2725 = vrot.lane.b32.xlu1 %v2931_v29, %s2830_s22  ;;  %1493 = vperm.xlu0 %2707, %v302_v12   ;;  %v322_v12 = vld [vmem:[%s4753_s1 + $0x228] sm:$0xff] }
 0x25b   : > { %1276 = vperm.xlu1 %2708, %v296_v17   ;;  %1271 = vperm.xlu0 %2707, %v295_v60   ;;  %v321_v17 = vld [vmem:[%s4753_s1 + $0x220] sm:$0xff]  ;;  %v316_v60 = vld [vmem:[%s4753_s1 + $0x1f8] sm:$0xff] }
 0x25f   : > { %1694 = vperm.xlu1 %2708, %v310_v33   ;;  %1689 = vperm.xlu0 %2707, %v309_v36   ;;  %v315_v33 = vld [vmem:[%s4753_s1 + $0x1f0] sm:$0xff]  ;;  %v324_v36 = vld [vmem:[%s4753_s1 + $0x238] sm:$0xff] }
 0x263   : > { %1498 = vperm.xlu1 %2708, %v303_v31   ;;  %2730 = vrot.lane.b32.xlu0 %v2886_v13, %s2831_s9  ;;  %v311_v13 = vld [vmem:[%s4753_s1 + $0x1d0] sm:$0xff] }
 0x264   : > { %v323_v31 = vld [vmem:[%s4753_s1 + $0x230] sm:$0xff] }
 0x267   : > { %1916 = vperm.xlu1 %2708, %v317_v50   ;;  %1503 = vperm.xlu0 %2707, %v304_v22   ;;  %v3600_v50 = vpop.permute.xlu0 %1105  ;;  %v3602_v22 = vpop.permute.xlu1 %1110 }
 0x26b   : > { %1281 = vperm.xlu1 %2708, %v297_v27   ;;  %1921 = vperm.xlu0 %2707, %v318_v62  }
 0x26f   : > { %1699 = vperm.xlu1 %2708, %v311_v13   ;;  %1286 = vperm.xlu0 %2707, %v298_v47  }
 0x273   : > { %1508 = vperm.xlu1 %2708, %v305_v10   ;;  %1704 = vperm.xlu0 %2707, %v312_v51  }
 0x277   : > { %2735 = vrot.lane.b32.xlu1 %v2931_v29, %s2832_s6  ;;  %1513 = vperm.xlu0 %2707, %v306_v54   ;;  %v314_v29 = vld [vmem:[%s4753_s1 + $0x1e8] sm:$0xff] }
 0x27b   : > { %1931 = vperm.xlu1 %2708, %v320_v46   ;;  %1926 = vperm.xlu0 %2707, %v319_v55  }
 0x27f   : > { %1296 = vperm.xlu1 %2708, %v300_v59   ;;  %1291 = vperm.xlu0 %2707, %v299_v63  }
 0x283   : > { %1714 = vperm.xlu1 %2708, %v314_v29   ;;  %1709 = vperm.xlu0 %2707, %v313_v2  }
 0x287   : > { %1523 = vperm.xlu1 %2708, %v308_v3   ;;  %1518 = vperm.xlu0 %2707, %v307_v8  }
 0x28b   : > { %1941 = vperm.xlu1 %2708, %v322_v12   ;;  %1936 = vperm.xlu0 %2707, %v321_v17  }
 0x28f   : > { %1724 = vperm.xlu1 %2708, %v316_v60   ;;  %1719 = vperm.xlu0 %2707, %v315_v33  }
 0x293   : > { %1951 = vperm.xlu1 %2708, %v324_v36   ;;  %1946 = vperm.xlu0 %2707, %v323_v31   ;;  %v3632_v31 = vld [vmem:[%s2983_s23] sm:$0xff] }
 0x2ad   : > { %v3604_v27 = vpop.permute.xlu0 %1145  ;;  %v3606_v62 = vpop.permute.xlu1 %1147 }
 0x2ae   : > { %4867 = vst [vmem:[#allocation51_spill] sm:$0xff] %v3604_v27  ;;  %4868 = vst [vmem:[#allocation52_spill] sm:$0xff] %v3606_v62 }
 0x2b1   : > { %v3608_v13 = vpop.permute.xlu0 %1149  ;;  %v3610_v47 = vpop.permute.xlu1 %1151 }
 0x2b2   : > { %4869 = vst [vmem:[#allocation53_spill] sm:$0xff] %v3608_v13  ;;  %4870 = vst [vmem:[#allocation54_spill] sm:$0xff] %v3610_v47 }
 0x2b5   : > { %v3612_v10 = vpop.permute.xlu0 %1153  ;;  %v3614_v51 = vpop.permute.xlu1 %1155 }
 0x2b6   : > { %4871 = vst [vmem:[#allocation55_spill] sm:$0xff] %v3612_v10  ;;  %4872 = vst [vmem:[#allocation56_spill] sm:$0xff] %v3614_v51 }
 0x2b9   : > { %v3616_v54 = vpop.permute.xlu0 %1157  ;;  %v3618_v46 = vpop.permute.xlu1 %1159 }
 0x2ba   : > { %4873 = vst [vmem:[#allocation57_spill] sm:$0xff] %v3616_v54  ;;  %4874 = vst [vmem:[#allocation58_spill] sm:$0xff] %v3618_v46  ;;  %v3637_v54 = vld [vmem:[%s2983_s23 + $0x8] sm:$0xff] }
 0x2bd   : > { %v3620_v55 = vpop.permute.xlu0 %1161  ;;  %v3622_v59 = vpop.permute.xlu1 %1163 }
 0x2be   : > { %4875 = vst [vmem:[#allocation59_spill] sm:$0xff] %v3620_v55  ;;  %4876 = vst [vmem:[#allocation60_spill] sm:$0xff] %v3622_v59  ;;  %v3706_v59 = vld [vmem:[%s2983_s23 + $0x38] sm:$0xff] }
 0x2bf   : > { %4881 = vst [vmem:[#allocation65_spill] sm:$0xff] %v3706_v59 }
 0x2c1   : > { %v3624_v63 = vpop.permute.xlu0 %1165 }
 0x2c2   : > { %4877 = vst [vmem:[#allocation61_spill] sm:$0xff] %v3624_v63  ;;  %v3683_v63 = vld [vmem:[%s2983_s23 + $0x20] sm:$0xff] }
 0x2c3   : > { %4878 = vst [vmem:[#allocation62_spill] sm:$0xff] %v3683_v63 }
 0x2ce   : > { %v1262_v29 = vpop.permute.xlu1 %1261 }
 0x2d2   : > { %v1267_v2 = vpop.permute.xlu0 %1266  ;;  %v1489_v3 = vpop.permute.xlu1 %1488 }
 0x2d6   : > { %v1494_v8 = vpop.permute.xlu0 %1493  ;;  %v2726_v12 = vpop.permute.xlu1 %2725 }
 0x2d7   : > { %v2728_v17 = vunpack.i.h.bf16 %v2726_v12  ;;  %v3626_v60 = vunpack.i.l.bf16 %v2726_v12 }
 0x2d9   : > { %v3629_v33 = vsel %vm1237_vm9, %v3626_v60, %v2728_v17  ;;  %v1242_v46 = vmul.f32 %v3632_v31, %v3626_v60  ;;  %v3641_v51 = vmul.f32 0.0, %v2728_v17  ;;  %v1245_v48 = vmul.f32 %v3644_v28, %v3626_v60 }
 0x2da   : > { %v1272_v36 = vpop.permute.xlu0 %1271  ;;  %v1243_v10 = vmul.f32 %v3637_v54, %v3629_v33  ;;  %v1277_v45 = vpop.permute.xlu1 %1276  ;;  %v1249_v55 = vmul.f32 %v3697_v58, %v3626_v60 }
 0x2db   : > { %v1299_v11 = vmul.f32 %v1262_v29, %v1242_v46  ;;  %v1301_v30 = vmul.f32 %v1262_v29, %v3641_v51  ;;  %v1302_v61 = vmul.f32 %v1267_v2, %v1245_v48 }
 0x2dc   : > { %v1300_v12 = vmul.f32 %v1262_v29, %v1243_v10  ;;  %v1246_v10 = vmul.f32 %v3654_v44, %v3629_v33 }
 0x2dd   : > { %1347 = vrot.lane.b32.xlu0 %v1299_v11, %s2833_s14 }
 0x2de   : > { %v3649_v25 = vpop.permute.xlu0 %1689  ;;  %1349 = vrot.lane.b32.xlu1 %v1300_v12, %s2833_s14  ;;  %v1303_v34 = vmul.f32 %v1267_v2, %v1246_v10  ;;  %v1304_v12 = vmul.f32 %v1267_v2, %v3641_v51  ;;  %v1695_v10 = vpop.permute.xlu1 %1694 }
 0x2e1   : > { %1351 = vrot.lane.b32.xlu0 %v1301_v30, %s2833_s14 }
 0x2e2   : > { %v2731_v46 = vpop.permute.xlu0 %2730  ;;  %1353 = vrot.lane.b32.xlu1 %v1302_v61, %s2833_s14 }
 0x2e3   : > { %v2733_v17 = vunpack.i.h.bf16 %v2731_v46  ;;  %v3660_v11 = vunpack.i.l.bf16 %v2731_v46 }
 0x2e5   : > { %v3664_v48 = vsel %vm1464_vm10, %v3660_v11, %v2733_v17  ;;  %1355 = vrot.lane.b32.xlu0 %v1303_v34, %s2833_s14  ;;  %v1469_v30 = vmul.f32 %v3632_v31, %v3660_v11  ;;  %v3670_v29 = vmul.f32 0.0, %v2733_v17  ;;  %v1472_v34 = vmul.f32 %v3644_v28, %v3660_v11 }
 0x2e6   : > { %1357 = vrot.lane.b32.xlu1 %v1304_v12, %s2833_s14  ;;  %v1470_v46 = vmul.f32 %v3637_v54, %v3664_v48  ;;  %v1473_v17 = vmul.f32 %v3654_v44, %v3664_v48  ;;  %v1477_v47 = vmul.f32 %v3706_v59, %v3664_v48 }
 0x2e7   : > { %v1526_v61 = vmul.f32 %v1489_v3, %v1469_v30  ;;  %v1528_v12 = vmul.f32 %v1489_v3, %v3670_v29  ;;  %v1529_v30 = vmul.f32 %v1494_v8, %v1472_v34 }
 0x2e8   : > { %v1527_v2 = vmul.f32 %v1489_v3, %v1470_v46  ;;  %v1499_v46 = vpop.permute.xlu1 %1498  ;;  %v1530_v40 = vmul.f32 %v1494_v8, %v1473_v17  ;;  %v1307_v17 = vmul.f32 %v1272_v36, %v3641_v51 }
 0x2e9   : > { %1574 = vrot.lane.b32.xlu0 %v1526_v61, %s2834_s17  ;;  %v1247_v61 = vmul.f32 %v3683_v63, %v3626_v60 }
 0x2ea   : > { %1576 = vrot.lane.b32.xlu1 %v1527_v2, %s2834_s17  ;;  %v3689_v2 = vld [vmem:[%s2983_s23 + $0x28] sm:$0xff] }
 0x2eb   : > { %4879 = vst [vmem:[#allocation63_spill] sm:$0xff] %v3689_v2  ;;  %v1248_v3 = vmul.f32 %v3689_v2, %v3629_v33  ;;  %v1305_v34 = vmul.f32 %v1272_v36, %v1247_v61 }
 0x2ed   : > { %1578 = vrot.lane.b32.xlu0 %v1528_v12, %s2834_s17  ;;  %v1531_v12 = vmul.f32 %v1494_v8, %v3670_v29  ;;  %v1306_v35 = vmul.f32 %v1272_v36, %v1248_v3  ;;  %v1308_v8 = vmul.f32 %v1277_v45, %v1249_v55  ;;  %v1727_v36 = vmul.f32 %v3632_v31, %v3649_v25 }
 0x2ee   : > { %1580 = vrot.lane.b32.xlu1 %v1529_v30, %s2834_s17  ;;  %v3701_v30 = vpop.permute.xlu1 %1916 }
 0x2f1   : > { %1582 = vrot.lane.b32.xlu0 %v1530_v40, %s2834_s17  ;;  %v1250_v40 = vmul.f32 %v3706_v59, %v3629_v33 }
 0x2f2   : > { %1584 = vrot.lane.b32.xlu1 %v1531_v12, %s2834_s17  ;;  %v3712_v3 = vpop.permute.xlu1 %1281  ;;  %v1310_v12 = vmul.f32 %v1277_v45, %v3641_v51 }
 0x2f3   : > { %v1309_v61 = vmul.f32 %v1277_v45, %v1250_v40  ;;  %v1730_v45 = vmul.f32 %v3644_v28, %v1695_v10 }
 0x2f5   : > { %1359 = vrot.lane.b32.xlu0 %v1305_v34, %s2833_s14  ;;  %v1729_v34 = vmul.f32 0.0, %v3649_v25 }
 0x2f6   : > { %1361 = vrot.lane.b32.xlu1 %v1306_v35, %s2833_s14  ;;  %v1728_v35 = vmul.f32 %v3637_v54, %v3649_v25  ;;  %v3722_v55 = vpop.permute.xlu1 %1699  ;;  %v3737_v25 = vld [vmem:[%s2983_s23 + $0x58] sm:$0xff] }
 0x2f9   : > { %1363 = vrot.lane.b32.xlu0 %v1307_v17, %s2833_s14  ;;  %v1731_v17 = vmul.f32 %v3654_v44, %v1695_v10 }
 0x2fa   : > { %1365 = vrot.lane.b32.xlu1 %v1308_v8, %s2833_s14  ;;  %v3730_v40 = vpop.permute.xlu1 %1508  ;;  %v1732_v8 = vmul.f32 0.0, %v1695_v10 }
 0x2fd   : > { %1367 = vrot.lane.b32.xlu0 %v1309_v61, %s2833_s14  ;;  %v1474_v61 = vmul.f32 %v3683_v63, %v3660_v11 }
 0x2fe   : > { %1369 = vrot.lane.b32.xlu1 %v1310_v12, %s2833_s14  ;;  %v1504_v12 = vpop.permute.xlu0 %1503  ;;  %v2736_v56 = vpop.permute.xlu1 %2735 }
 0x2ff   : > { %v3748_v13 = vunpack.i.l.bf16 %v2736_v56 }
 0x301   : > { %1775 = vrot.lane.b32.xlu0 %v1727_v36, %s2835_s18  ;;  %v1124_v36 = vmul.f32 %v3737_v25, %v3493_v49  ;;  %v1534_v49 = vmul.f32 %v1499_v46, %v3670_v29 }
 0x302   : > { %1777 = vrot.lane.b32.xlu1 %v1728_v35, %s2835_s18  ;;  %v1475_v35 = vmul.f32 %v3689_v2, %v3664_v48  ;;  %v1922_v24 = vpop.permute.xlu0 %1921  ;;  %v3800_v27 = vpop.permute.xlu1 %1931 }
 0x304   : > { %v1533_v10 = vmul.f32 %v1499_v46, %v1475_v35 }
 0x305   : > { %1779 = vrot.lane.b32.xlu0 %v1729_v34, %s2835_s18  ;;  %v1532_v34 = vmul.f32 %v1499_v46, %v1474_v61  ;;  %v1537_v46 = vmul.f32 %v1504_v12, %v3670_v29 }
 0x306   : > { %1781 = vrot.lane.b32.xlu1 %v1730_v45, %s2835_s18  ;;  %v1476_v45 = vmul.f32 %v3697_v58, %v3660_v11  ;;  %v1287_v35 = vpop.permute.xlu0 %1286 }
 0x309   : > { %1783 = vrot.lane.b32.xlu0 %v1731_v17, %s2835_s18  ;;  %v2738_v17 = vunpack.i.h.bf16 %v2736_v56  ;;  %v1897_v56 = vmul.f32 %v3632_v31, %v3748_v13 }
 0x30a   : > { %1785 = vrot.lane.b32.xlu1 %v1732_v8, %s2835_s18  ;;  %v1535_v8 = vmul.f32 %v1504_v12, %v1476_v45  ;;  %v1705_v45 = vpop.permute.xlu0 %1704 }
 0x30b   : > { %v3757_v61 = vsel %vm1892_vm11, %v3748_v13, %v2738_v17  ;;  %v1738_v32 = vmul.f32 0.0, %v1705_v45 }
 0x30d   : > { %1167 = vrot.lane.b32.xlu0 %v1124_v36, %s2825_s27  ;;  %v1536_v36 = vmul.f32 %v1504_v12, %v1477_v47  ;;  %v1954_v47 = vmul.f32 %v3701_v30, %v1897_v56  ;;  %v1900_v12 = vmul.f32 %v3644_v28, %v3748_v13 }
 0x30e   : > { %1586 = vrot.lane.b32.xlu1 %v1532_v34, %s2834_s17  ;;  %v1898_v34 = vmul.f32 %v3637_v54, %v3757_v61  ;;  %v3780_v56 = vpop.permute.xlu0 %1513 }
 0x311   : > { %1588 = vrot.lane.b32.xlu0 %v1533_v10, %s2834_s17  ;;  %v3766_v10 = vmul.f32 0.0, %v2738_v17 }
 0x312   : > { %1590 = vrot.lane.b32.xlu1 %v1534_v49, %s2834_s17  ;;  %v1955_v49 = vmul.f32 %v3701_v30, %v1898_v34  ;;  %v3784_v34 = vld [vmem:[%s2983_s23 + $0x40] sm:$0xff] }
 0x313   : > { %v1956_v17 = vmul.f32 %v3701_v30, %v3766_v10  ;;  %v1959_v30 = vmul.f32 %v1922_v24, %v3766_v10 }
 0x315   : > { %1592 = vrot.lane.b32.xlu0 %v1535_v8, %s2834_s17  ;;  %v1901_v8 = vmul.f32 %v3654_v44, %v3757_v61 }
 0x316   : > { %1594 = vrot.lane.b32.xlu1 %v1536_v36, %s2834_s17  ;;  %v1957_v36 = vmul.f32 %v1922_v24, %v1900_v12 }
 0x319   : > { %1596 = vrot.lane.b32.xlu0 %v1537_v46, %s2834_s17  ;;  %v1958_v46 = vmul.f32 %v1922_v24, %v1901_v8  ;;  %v1313_v24 = vmul.f32 %v3712_v3, %v3641_v51 }
 0x31a   : > { %2002 = vrot.lane.b32.xlu1 %v1954_v47, %s2836_s19  ;;  %v1251_v47 = vmul.f32 %v3784_v34, %v3626_v60 }
 0x31d   : > { %2004 = vrot.lane.b32.xlu0 %v1955_v49, %s2836_s19  ;;  %v3791_v49 = vld [vmem:[%s2983_s23 + $0x48] sm:$0xff] }
 0x31e   : > { %2006 = vrot.lane.b32.xlu1 %v1956_v17, %s2836_s19  ;;  %v1252_v12 = vmul.f32 %v3791_v49, %v3629_v33  ;;  %v1311_v17 = vmul.f32 %v3712_v3, %v1251_v47  ;;  %v1254_v47 = vmul.f32 %v3737_v25, %v3629_v33 }
 0x320   : > { %v1312_v8 = vmul.f32 %v3712_v3, %v1252_v12  ;;  %v1315_v12 = vmul.f32 %v1287_v35, %v1254_v47  ;;  %v1316_v3 = vmul.f32 %v1287_v35, %v3641_v51 }
 0x321   : > { %2008 = vrot.lane.b32.xlu0 %v1957_v36, %s2836_s19  ;;  %v3798_v36 = vpop.permute.xlu0 %1926 }
 0x322   : > { %2010 = vrot.lane.b32.xlu1 %v1958_v46, %s2836_s19  ;;  %v3806_v46 = vld [vmem:[%s2983_s23 + $0x50] sm:$0xff] }
 0x323   : > { %v1253_v62 = vmul.f32 %v3806_v46, %v3626_v60 }
 0x325   : > { %2012 = vrot.lane.b32.xlu0 %v1959_v30, %s2836_s19  ;;  %v1314_v30 = vmul.f32 %v1287_v35, %v1253_v62  ;;  %v3814_v9 = vpop.permute.xlu0 %1291  ;;  %v1734_v62 = vmul.f32 %v3689_v2, %v3722_v55  ;;  %v1735_v35 = vmul.f32 0.0, %v3722_v55 }
 0x326   : > { %1371 = vrot.lane.b32.xlu1 %v1311_v17, %s2833_s14  ;;  %v3816_v17 = vpop.permute.xlu1 %1296 }
 0x329   : > { %1373 = vrot.lane.b32.xlu0 %v1312_v8, %s2833_s14  ;;  %v1733_v8 = vmul.f32 %v3683_v63, %v3722_v55  ;;  %v3843_v55 = vld [vmem:[%s2983_s23 + $0x60] sm:$0xff] }
 0x32a   : > { %1375 = vrot.lane.b32.xlu1 %v1313_v24, %s2833_s14  ;;  %v3826_v24 = vpop.permute.xlu0 %1709  ;;  %v3828_v47 = vpop.permute.xlu1 %1714 }
 0x32d   : > { %1377 = vrot.lane.b32.xlu0 %v1314_v30, %s2833_s14  ;;  %v1736_v30 = vmul.f32 %v3697_v58, %v1705_v45 }
 0x32e   : > { %1379 = vrot.lane.b32.xlu1 %v1315_v12, %s2833_s14  ;;  %v1737_v12 = vmul.f32 %v3706_v59, %v1705_v45  ;;  %v3838_v18 = vpop.permute.xlu1 %1523  ;;  %v3859_v45 = vld [vmem:[%s2983_s23 + $0x70] sm:$0xff] }
 0x331   : > { %1381 = vrot.lane.b32.xlu0 %v1316_v3, %s2833_s14  ;;  %v3836_v3 = vpop.permute.xlu0 %1518 }
 0x332   : > { %1787 = vrot.lane.b32.xlu1 %v1733_v8, %s2835_s18  ;;  %v1125_v8 = vmul.f32 %v3843_v55, %v3600_v50  ;;  %v3855_v57 = vpop.permute.xlu1 %1941 }
 0x335   : > { %1789 = vrot.lane.b32.xlu0 %v1734_v62, %s2835_s18  ;;  %v3849_v62 = vld [vmem:[%s2983_s23 + $0x68] sm:$0xff]  ;;  %v3853_v39 = vpop.permute.xlu0 %1936 }
 0x336   : > { %1791 = vrot.lane.b32.xlu1 %v1735_v35, %s2835_s18  ;;  %v1126_v35 = vmul.f32 %v3849_v62, %v3600_v50  ;;  %v1478_v50 = vmul.f32 %v3784_v34, %v3660_v11  ;;  %v3877_v53 = vpop.permute.xlu1 %1724 }
 0x337   : > { %4883 = vst [vmem:[#allocation67_spill] sm:$0xff] %v3877_v53 }
 0x338   : > { %v1538_v41 = vmul.f32 %v3730_v40, %v1478_v50  ;;  %v1481_v50 = vmul.f32 %v3737_v25, %v3664_v48 }
 0x339   : > { %1793 = vrot.lane.b32.xlu0 %v1736_v30, %s2835_s18  ;;  %v1127_v30 = vmul.f32 %v3859_v45, %v3602_v22  ;;  %v3875_v52 = vpop.permute.xlu0 %1719 }
 0x33a   : > { %1795 = vrot.lane.b32.xlu1 %v1737_v12, %s2835_s18  ;;  %v3865_v12 = vld [vmem:[%s2983_s23 + $0x78] sm:$0xff]  ;;  %4882 = vst [vmem:[#allocation66_spill] sm:$0xff] %v3875_v52 }
 0x33d   : > { %1797 = vrot.lane.b32.xlu0 %v1738_v32, %s2835_s18  ;;  %v1128_v32 = vmul.f32 %v3865_v12, %v3602_v22  ;;  %v1540_v22 = vmul.f32 %v3730_v40, %v3670_v29  ;;  %v3890_v53 = vpop.permute.xlu0 %1946 }
 0x33e   : > { %1169 = vrot.lane.b32.xlu1 %v1125_v8, %s2825_s27  ;;  %v1479_v8 = vmul.f32 %v3791_v49, %v3664_v48 }
 0x341   : > { %1171 = vrot.lane.b32.xlu0 %v1126_v35, %s2825_s27  ;;  %v1539_v35 = vmul.f32 %v3730_v40, %v1479_v8  ;;  %v1902_v40 = vmul.f32 %v3683_v63, %v3748_v13  ;;  %v1543_v8 = vmul.f32 %v3780_v56, %v3670_v29  ;;  %v1905_v63 = vmul.f32 %v3706_v59, %v3757_v61 }
 0x342   : > { %1173 = vrot.lane.b32.xlu1 %v1127_v30, %s2825_s27  ;;  %v1480_v30 = vmul.f32 %v3806_v46, %v3660_v11  ;;  %v1255_v59 = vmul.f32 %v3843_v55, %v3626_v60 }
 0x344   : > { %v1541_v52 = vmul.f32 %v3780_v56, %v1480_v30 }
 0x345   : > { %1175 = vrot.lane.b32.xlu0 %v1128_v32, %s2825_s27  ;;  %v3892_v32 = vpop.permute.xlu1 %1951 }
 0x346   : > { %1598 = vrot.lane.b32.xlu1 %v1538_v41, %s2834_s17  ;;  %4884 = vst [vmem:[#allocation68_spill] sm:$0xff] %v3892_v32  ;;  %v1542_v41 = vmul.f32 %v3780_v56, %v1481_v50 }
 0x349   : > { %1600 = vrot.lane.b32.xlu0 %v1539_v35, %s2834_s17  ;;  %v1903_v35 = vmul.f32 %v3689_v2, %v3757_v61 }
 0x34a   : > { %1602 = vrot.lane.b32.xlu1 %v1540_v22, %s2834_s17  ;;  %v1960_v22 = vmul.f32 %v3798_v36, %v1902_v40 }
 0x34b   : > { %v1961_v50 = vmul.f32 %v3798_v36, %v1903_v35 }
 0x34d   : > { %1604 = vrot.lane.b32.xlu0 %v1541_v52, %s2834_s17  ;;  %v1904_v52 = vmul.f32 %v3697_v58, %v3748_v13 }
 0x34e   : > { %1606 = vrot.lane.b32.xlu1 %v1542_v41, %s2834_s17  ;;  %v1962_v41 = vmul.f32 %v3798_v36, %v3766_v10  ;;  %v1965_v36 = vmul.f32 %v3800_v27, %v3766_v10 }
 0x34f   : > { %v3904_v30 = vpop.permute.xlu0 %1347  ;;  %v1963_v40 = vmul.f32 %v3800_v27, %v1904_v52  ;;  %v1256_v52 = vmul.f32 %v3849_v62, %v3629_v33 }
 0x350   : > { %v3906_v32 = vpop.permute.xlu1 %1349 }
 0x351   : > { %1608 = vrot.lane.b32.xlu0 %v1543_v8, %s2834_s17 }
 0x352   : > { %2014 = vrot.lane.b32.xlu1 %v1960_v22, %s2836_s19  ;;  %v1964_v22 = vmul.f32 %v3800_v27, %v1905_v63  ;;  %v1318_v63 = vmul.f32 %v3814_v9, %v1256_v52 }
 0x353   : > { %v3914_v56 = vpop.permute.xlu0 %1351 }
 0x354   : > { %v3916_v2 = vpop.permute.xlu1 %1353 }
 0x355   : > { %2016 = vrot.lane.b32.xlu0 %v1961_v50, %s2836_s19 }
 0x356   : > { %2018 = vrot.lane.b32.xlu1 %v1962_v41, %s2836_s19  ;;  %v1317_v41 = vmul.f32 %v3814_v9, %v1255_v59  ;;  %v1258_v59 = vmul.f32 %v3865_v12, %v3629_v33  ;;  %v1739_v33 = vmul.f32 %v3784_v34, %v3826_v24 }
 0x357   : > { %v3925_v8 = vpop.permute.xlu0 %1355 }
 0x358   : > { %v3927_v35 = vpop.permute.xlu1 %1357 }
 0x359   : > { %2020 = vrot.lane.b32.xlu0 %v1963_v40, %s2836_s19  ;;  %v1319_v40 = vmul.f32 %v3814_v9, %v3641_v51  ;;  %v1322_v9 = vmul.f32 %v3816_v17, %v3641_v51  ;;  %v1741_v51 = vmul.f32 0.0, %v3826_v24 }
 0x35a   : > { %2022 = vrot.lane.b32.xlu1 %v1964_v22, %s2836_s19  ;;  %v1257_v22 = vmul.f32 %v3859_v45, %v3626_v60 }
 0x35b   : > { %v3936_v50 = vpop.permute.xlu0 %1574 }
 0x35c   : > { %4885 = vst [vmem:[#allocation69_spill] sm:$0xff] %v3936_v50  ;;  %v3941_v58 = vpop.permute.xlu1 %1576 }
 0x35d   : > { %2024 = vrot.lane.b32.xlu0 %v1965_v36, %s2836_s19  ;;  %v1320_v36 = vmul.f32 %v3816_v17, %v1257_v22 }
 0x35e   : > { %1383 = vrot.lane.b32.xlu1 %v1317_v41, %s2833_s14  ;;  %v1321_v41 = vmul.f32 %v3816_v17, %v1258_v59  ;;  %v1742_v59 = vmul.f32 %v3806_v46, %v3828_v47 }
 0x35f   : > { %v3946_v27 = vpop.permute.xlu0 %1578 }
 0x360   : > { %4886 = vst [vmem:[#allocation70_spill] sm:$0xff] %v3946_v27  ;;  %v3952_v50 = vpop.permute.xlu1 %1580 }
 0x361   : > { %1385 = vrot.lane.b32.xlu0 %v1318_v63, %s2833_s14 }
 0x362   : > { %1387 = vrot.lane.b32.xlu1 %v1319_v40, %s2833_s14  ;;  %v1740_v40 = vmul.f32 %v3791_v49, %v3826_v24  ;;  %v1744_v24 = vmul.f32 0.0, %v3828_v47 }
 0x363   : > { %v3959_v52 = vpop.permute.xlu0 %1582 }
 0x364   : > { %v3962_v27 = vpop.permute.xlu1 %1584 }
 0x365   : > { %1389 = vrot.lane.b32.xlu0 %v1320_v36, %s2833_s14 }
 0x366   : > { %1391 = vrot.lane.b32.xlu1 %v1321_v41, %s2833_s14  ;;  %v1743_v41 = vmul.f32 %v3737_v25, %v3828_v47 }
 0x367   : > { %v3968_v60 = vpop.permute.xlu0 %1359 }
 0x368   : > { %4887 = vst [vmem:[#allocation71_spill] sm:$0xff] %v3968_v60  ;;  %v3972_v63 = vpop.permute.xlu1 %1361 }
 0x369   : > { %4888 = vst [vmem:[#allocation72_spill] sm:$0xff] %v3972_v63  ;;  %1393 = vrot.lane.b32.xlu0 %v1322_v9, %s2833_s14 }
 0x36a   : > { %1799 = vrot.lane.b32.xlu1 %v1739_v33, %s2835_s18  ;;  %v1482_v33 = vmul.f32 %v3843_v55, %v3660_v11 }
 0x36b   : > { %v3978_v22 = vpop.permute.xlu0 %1363 }
 0x36c   : > { %4889 = vst [vmem:[#allocation73_spill] sm:$0xff] %v3978_v22  ;;  %v3981_v17 = vpop.permute.xlu1 %1365 }
 0x36d   : > { %4890 = vst [vmem:[#allocation74_spill] sm:$0xff] %v3981_v17  ;;  %1801 = vrot.lane.b32.xlu0 %v1740_v40, %s2835_s18 }
 0x36e   : > { %1803 = vrot.lane.b32.xlu1 %v1741_v51, %s2835_s18  ;;  %v1483_v51 = vmul.f32 %v3849_v62, %v3664_v48 }
 0x36f   : > { %v3987_v36 = vpop.permute.xlu0 %1367 }
 0x370   : > { %4891 = vst [vmem:[#allocation75_spill] sm:$0xff] %v3987_v36  ;;  %v3991_v9 = vpop.permute.xlu1 %1369  ;;  %v1544_v36 = vmul.f32 %v3836_v3, %v1482_v33  ;;  %v1485_v33 = vmul.f32 %v3865_v12, %v3664_v48  ;;  %v1549_v48 = vmul.f32 %v3838_v18, %v3670_v29 }
 0x371   : > { %4892 = vst [vmem:[#allocation76_spill] sm:$0xff] %v3991_v9  ;;  %1805 = vrot.lane.b32.xlu0 %v1742_v59, %s2835_s18  ;;  %v1545_v59 = vmul.f32 %v3836_v3, %v1483_v51  ;;  %v1484_v9 = vmul.f32 %v3859_v45, %v3660_v11  ;;  %v338_v11 = vmul.f32 %v3637_v54, %v3228_v14 }
 0x372   : > { %1807 = vrot.lane.b32.xlu1 %v1743_v41, %s2835_s18  ;;  %v1546_v41 = vmul.f32 %v3836_v3, %v3670_v29  ;;  %v1548_v51 = vmul.f32 %v3838_v18, %v1485_v33  ;;  %v1906_v3 = vmul.f32 %v3784_v34, %v3748_v13  ;;  %v337_v34 = vmul.f32 %v3632_v31, %v3238_v7 }
 0x373   : > { %v3998_v40 = vpop.permute.xlu0 %1775  ;;  %v393_v54 = vmul.f32 %v2957_v38, %v3230_v6  ;;  %v340_v29 = vmul.f32 %v3654_v44, %v3228_v14  ;;  %v396_v31 = vmul.f32 %v2955_v37, %v3230_v6 }
 0x374   : > { %v4003_v17 = vpop.permute.xlu1 %1777  ;;  %v394_v44 = vmul.f32 %v2957_v38, %v337_v34 }
 0x375   : > { %1809 = vrot.lane.b32.xlu0 %v1744_v24, %s2835_s18  ;;  %v1547_v24 = vmul.f32 %v3838_v18, %v1484_v9  ;;  %v1907_v9 = vmul.f32 %v3791_v49, %v3757_v61  ;;  %v339_v18 = vmul.f32 %v3644_v28, %v3238_v7  ;;  %v554_v28 = vsel %vm553_vm6, %v3170_v15, %v3172_v16 }
 0x376   : > { %1610 = vrot.lane.b32.xlu1 %v1544_v36, %s2834_s17  ;;  %v398_v34 = vmul.f32 %v2955_v37, %v340_v29  ;;  %v594_v63 = vadd.f32 %v554_v28, %v393_v54 }
 0x377   : > { %v4008_v47 = vpop.permute.xlu0 %1779 }
 0x378   : > { %v4014_v22 = vpop.permute.xlu1 %1781 }
 0x379   : > { %1612 = vrot.lane.b32.xlu0 %v1545_v59, %s2834_s17 }
 0x37a   : > { %1614 = vrot.lane.b32.xlu1 %v1546_v41, %s2834_s17  ;;  %v1966_v41 = vmul.f32 %v3853_v39, %v1906_v3  ;;  %v1908_v3 = vmul.f32 %v3806_v46, %v3748_v13  ;;  %v555_v46 = vsel %vm553_vm6, %v3172_v16, %v3174_v19 }
 0x37b   : > { %v4021_v36 = vpop.permute.xlu0 %1783 }
 0x37c   : > { %v4026_v60 = vpop.permute.xlu1 %1785 }
 0x37d   : > { %1616 = vrot.lane.b32.xlu0 %v1547_v24, %s2834_s17  ;;  %v395_v24 = vmul.f32 %v2957_v38, %v338_v11  ;;  %v346_v11 = vmul.f32 %v3791_v49, %v3228_v14  ;;  %v1909_v38 = vmul.f32 %v3737_v25, %v3757_v61  ;;  %v397_v49 = vmul.f32 %v2955_v37, %v339_v18 }
 0x37e   : > { %1618 = vrot.lane.b32.xlu1 %v1548_v51, %s2834_s17  ;;  %v1967_v51 = vmul.f32 %v3853_v39, %v1907_v9  ;;  %v556_v9 = vsel %vm553_vm6, %v3176_v20, %v3178_v21  ;;  %v557_v20 = vsel %vm553_vm6, %v3178_v21, %v3180_v23  ;;  %v595_v37 = vadd.f32 %v555_v46, %v394_v44 }
 0x37f   : > { %v4036_v59 = vpop.permute.xlu0 %1167  ;;  %v407_v16 = vmul.f32 %v2973_v43, %v346_v11  ;;  %v596_v43 = vadd.f32 %v3174_v19, %v395_v24  ;;  %v597_v29 = vadd.f32 %v556_v9, %v396_v31  ;;  %v784_v21 = vsel %vm782_vm7, %v3206_v0, %v3212_v5  ;;  %v4898_v31 = vld [vmem:[#allocation13_spill] sm:$0xff]  ;;  %v4899_v11 = vld [vmem:[#allocation28_spill] sm:$0xff] }
 0x380   : > { %v4041_v33 = vpop.permute.xlu1 %1586  ;;  %v598_v19 = vadd.f32 %v557_v20, %v397_v49  ;;  %v4901_v9 = vld [vmem:[#allocation29_spill] sm:$0xff]  ;;  %v824_v49 = vadd.f32 %v784_v21, %v595_v37  ;;  %v4904_v20 = vld [vmem:[#allocation31_spill] sm:$0xff]  ;;  %v4908_v37 = vld [vmem:[#allocation24_spill] sm:$0xff] }
 0x381   : > { %4893 = vst [vmem:[#allocation77_spill] sm:$0xff] %v4041_v33  ;;  %1620 = vrot.lane.b32.xlu0 %v1549_v48, %s2834_s17  ;;  %v348_v33 = vmul.f32 %v3737_v25, %v3228_v14  ;;  %v1969_v25 = vmul.f32 %v3855_v57, %v1908_v3  ;;  %v825_v44 = vadd.f32 %v3212_v5, %v596_v43  ;;  %v4906_v43 = vld [vmem:[#allocation32_spill] sm:$0xff] }
 0x382   : > { %2026 = vrot.lane.b32.xlu1 %v1966_v41, %s2836_s19  ;;  %v1968_v41 = vmul.f32 %v3853_v39, %v3766_v10  ;;  %v783_v39 = vsel %vm782_vm7, %v3208_v1, %v3206_v0  ;;  %v785_v1 = vsel %vm782_vm7, %v3210_v4, %v3216_v26  ;;  %v4900_v4 = vld [vmem:[#allocation27_spill] sm:$0xff] }
 0x383   : > { %v4057_v48 = vpop.permute.xlu0 %1588  ;;  %v823_v0 = vadd.f32 %v783_v39, %v594_v63  ;;  %v1009_v46 = vsel %vm1008_vm8, %v4900_v4, %v4899_v11  ;;  %v4905_v39 = vld [vmem:[#allocation30_spill] sm:$0xff]  ;;  %v4912_v4 = vld [vmem:[#allocation53_spill] sm:$0xff] }
 0x384   : > { %4894 = vst [vmem:[#allocation78_spill] sm:$0xff] %v4057_v48  ;;  %v4077_v15 = vpop.permute.xlu1 %1590  ;;  %v410_v48 = vmul.f32 %v2971_v42, %v348_v33  ;;  %v599_v42 = vadd.f32 %v3180_v23, %v398_v34  ;;  %v4895_v33 = vld [vmem:[#allocation16_spill] sm:$0xff]  ;;  %v4903_v34 = vld [vmem:[#allocation23_spill] sm:$0xff] }
 0x385   : > { %2028 = vrot.lane.b32.xlu0 %v1967_v51, %s2836_s19  ;;  %v786_v54 = vsel %vm782_vm7, %v3216_v26, %v4895_v33  ;;  %v1970_v51 = vmul.f32 %v3855_v57, %v1909_v38  ;;  %v4897_v23 = vld [vmem:[#allocation12_spill] sm:$0xff]  ;;  %v1010_v26 = vsel %vm1008_vm8, %v4899_v11, %v4901_v9  ;;  %v4911_v11 = vld [vmem:[#allocation54_spill] sm:$0xff] }
 0x386   : > { %2030 = vrot.lane.b32.xlu1 %v1968_v41, %s2836_s19  ;;  %v608_v24 = vadd.f32 %v4897_v23, %v407_v16  ;;  %v611_v28 = vadd.f32 %v4898_v31, %v410_v48  ;;  %v1971_v41 = vmul.f32 %v3855_v57, %v3766_v10  ;;  %v828_v63 = vadd.f32 %v4895_v33, %v599_v42  ;;  %v4907_v57 = vld [vmem:[#allocation66_spill] sm:$0xff] }
 0x387   : > { %v4092_v18 = vpop.permute.xlu0 %1592  ;;  %v826_v48 = vadd.f32 %v785_v1, %v597_v29  ;;  %v827_v5 = vadd.f32 %v786_v54, %v598_v19  ;;  %v1012_v23 = vsel %vm1008_vm8, %v4904_v20, %v4906_v43  ;;  %v1049_v42 = vadd.f32 %v1009_v46, %v823_v0  ;;  %v4909_v54 = vld [vmem:[#allocation52_spill] sm:$0xff]  ;;  %v4910_v19 = vld [vmem:[#allocation51_spill] sm:$0xff] }
 0x388   : > { %v4106_v3 = vpop.permute.xlu1 %1594  ;;  %v837_v16 = vadd.f32 %v4903_v34, %v608_v24  ;;  %v840_v29 = vadd.f32 %v4908_v37, %v611_v28  ;;  %v1050_v21 = vadd.f32 %v1010_v26, %v824_v49  ;;  %v1051_v1 = vadd.f32 %v4901_v9, %v825_v44  ;;  %v4913_v44 = vld [vmem:[#allocation40_spill] sm:$0xff]  ;;  %v4914_v26 = vld [vmem:[#allocation42_spill] sm:$0xff] }
 0x389   : > { %4896 = vst [vmem:[#allocation16_spill] sm:$0xff] %v4106_v3  ;;  %2032 = vrot.lane.b32.xlu0 %v1969_v25, %s2836_s19  ;;  %v1011_v25 = vsel %vm1008_vm8, %v4905_v39, %v4904_v20  ;;  %v1054_v33 = vadd.f32 %v4906_v43, %v828_v63  ;;  %v1177_v24 = vsel %vm331_vm5, %v4910_v19, %v4909_v54  ;;  %v4915_v39 = vld [vmem:[#allocation60_spill] sm:$0xff]  ;;  %v4916_v43 = vld [vmem:[#allocation59_spill] sm:$0xff] }
 0x38a   : > { %2034 = vrot.lane.b32.xlu1 %v1970_v51, %s2836_s19  ;;  %v1745_v51 = vmul.f32 %v3843_v55, %v4907_v57  ;;  %v1178_v34 = vsel %vm331_vm5, %v4912_v4, %v4911_v11  ;;  %v1746_v20 = vmul.f32 %v3849_v62, %v4907_v57  ;;  %v1052_v0 = vadd.f32 %v1011_v25, %v826_v48 }
 0x38b   : > { %v4121_v38 = vpop.permute.xlu0 %1596  ;;  %v1053_v46 = vadd.f32 %v1012_v23, %v827_v5  ;;  %v1063_v9 = vadd.f32 %v4913_v44, %v837_v16  ;;  %v1209_v49 = vadd.f32 %v4910_v19, %v1049_v42  ;;  %v1211_v63 = vadd.f32 %v4909_v54, %v1051_v1  ;;  %v4917_v23 = vld [vmem:[#allocation67_spill] sm:$0xff]  ;;  %v4919_v19 = vld [vmem:[#allocation41_spill] sm:$0xff] }
 0x38c   : > { %4902 = vst [vmem:[#allocation12_spill] sm:$0xff] %v4121_v38  ;;  %v4133_v31 = vpop.permute.xlu1 %2002  ;;  %v1181_v37 = vsel %vm331_vm5, %v4916_v43, %v4915_v39  ;;  %v1747_v38 = vmul.f32 0.0, %v4907_v57  ;;  %v1210_v48 = vadd.f32 %v1177_v24, %v1050_v21  ;;  %v1212_v5 = vadd.f32 %v4912_v4, %v1052_v0  ;;  %v4918_v21 = vld [vmem:[#allocation39_spill] sm:$0xff]  ;;  %v4921_v4 = vld [vmem:[#allocation61_spill] sm:$0xff] }
 0x38d   : > { %2036 = vrot.lane.b32.xlu0 %v1971_v41, %s2836_s19  ;;  %v4152_v41 = vadd.f32 %v4914_v26, %v840_v29  ;;  %v1213_v16 = vadd.f32 %v1178_v34, %v1053_v46  ;;  %v1214_v25 = vadd.f32 %v4911_v11, %v1054_v33  ;;  %v1748_v29 = vmul.f32 %v3859_v45, %v4917_v23  ;;  %v4920_v11 = vld [vmem:[#allocation43_spill] sm:$0xff] }
 0x38e   : > { %1811 = vrot.lane.b32.xlu1 %v1745_v51, %s2835_s18  ;;  %v1910_v42 = vmul.f32 %v3843_v55, %v3748_v13  ;;  %v1911_v1 = vmul.f32 %v3849_v62, %v3757_v61  ;;  %v1221_v54 = vadd.f32 %v4916_v43, %v4918_v21  ;;  %v1222_v24 = vadd.f32 %v1181_v37, %v4919_v19  ;;  %v4923_v37 = vld [vmem:[#allocation70_spill] sm:$0xff] }
 0x38f   : > { %v4148_v28 = vpop.permute.xlu0 %2004  ;;  %v1223_v33 = vadd.f32 %v4915_v39, %v1063_v9  ;;  %v1224_v34 = vadd.f32 %v4921_v4, %v4920_v11  ;;  %v1749_v55 = vmul.f32 %v3865_v12, %v4917_v23  ;;  %v1750_v46 = vmul.f32 0.0, %v4917_v23  ;;  %v4924_v23 = vld [vmem:[#allocation68_spill] sm:$0xff] }
 0x390   : > { %v4160_v51 = vpop.permute.xlu1 %2006  ;;  %v1396_v44 = vsel %vm1395_vm12, %v3904_v30, %v3906_v32  ;;  %v1397_v9 = vsel %vm1395_vm12, %v3906_v32, %v3914_v56  ;;  %v1398_v39 = vsel %vm1395_vm12, %v3916_v2, %v3925_v8  ;;  %v1399_v32 = vsel %vm1395_vm12, %v3925_v8, %v3927_v35  ;;  %v4922_v56 = vld [vmem:[#allocation69_spill] sm:$0xff] }
 0x391   : > { %1813 = vrot.lane.b32.xlu0 %v1746_v20, %s2835_s18  ;;  %v1912_v20 = vmul.f32 %v3859_v45, %v3748_v13  ;;  %v1972_v13 = vmul.f32 %v3890_v53, %v1910_v42  ;;  %v1974_v45 = vmul.f32 %v3890_v53, %v3766_v10  ;;  %v1623_v43 = vsel %vm1622_vm13, %v4922_v56, %v3941_v58 }
 0x392   : > { %1815 = vrot.lane.b32.xlu1 %v1747_v38, %s2835_s18  ;;  %v1913_v38 = vmul.f32 %v3865_v12, %v3757_v61  ;;  %v1973_v61 = vmul.f32 %v3890_v53, %v1911_v1  ;;  %v1624_v53 = vsel %vm1622_vm13, %v3941_v58, %v4923_v37  ;;  %v1437_v1 = vadd.f32 %v1396_v44, %v1210_v48 }
 0x393   : > { %v4172_v57 = vpop.permute.xlu0 %2008  ;;  %v1438_v21 = vadd.f32 %v1397_v9, %v1211_v63  ;;  %v1977_v8 = vmul.f32 %v4924_v23, %v3766_v10  ;;  %v1436_v35 = vadd.f32 %v3904_v30, %v1209_v49  ;;  %v1439_v11 = vadd.f32 %v3916_v2, %v1212_v5 }
 0x394   : > { %v4186_v0 = vpop.permute.xlu1 %2010  ;;  %v1976_v42 = vmul.f32 %v4924_v23, %v1913_v38  ;;  %v1440_v3 = vadd.f32 %v1398_v39, %v1213_v16  ;;  %v1441_v58 = vadd.f32 %v1399_v32, %v1214_v25  ;;  %v1664_v37 = vadd.f32 %v1623_v43, %v1437_v1 }
 0x395   : > { %1817 = vrot.lane.b32.xlu0 %v1748_v29, %s2835_s18  ;;  %v1975_v29 = vmul.f32 %v4924_v23, %v1912_v20  ;;  %v1665_v20 = vadd.f32 %v1624_v53, %v1438_v21  ;;  %v1626_v63 = vsel %vm1622_vm13, %v3959_v52, %v3962_v27  ;;  %v1824_v10 = vsel %vm1823_vm14, %v3998_v40, %v4003_v17 }
 0x396   : > { %1819 = vrot.lane.b32.xlu1 %v1749_v55, %s2835_s18  ;;  %v1825_v2 = vsel %vm1823_vm14, %v4003_v17, %v4008_v47  ;;  %v1666_v49 = vadd.f32 %v3952_v50, %v1439_v11  ;;  %v1625_v5 = vsel %vm1622_vm13, %v3952_v50, %v3959_v52  ;;  %v1827_v27 = vsel %vm1823_vm14, %v4021_v36, %v4026_v60 }
 0x397   : > { %v2013_v26 = vpop.permute.xlu0 %2012  ;;  %v1182_v17 = vsel %vm331_vm5, %v4921_v4, %v4036_v59  ;;  %v2051_v47 = vsel %vm2050_vm15, %v4133_v31, %v4148_v28  ;;  %v2052_v50 = vsel %vm2050_vm15, %v4148_v28, %v4160_v51  ;;  %v1668_v60 = vadd.f32 %v1626_v63, %v1441_v58  ;;  %v4925_v51 = vld [vmem:[#allocation44_spill] sm:$0xff] }
 0x398   : > { %v1372_v19 = vpop.permute.xlu1 %1371  ;;  %v1667_v44 = vadd.f32 %v1625_v5, %v1440_v3  ;;  %v1826_v4 = vsel %vm1823_vm14, %v4014_v22, %v4021_v36  ;;  %v2054_v9 = vsel %vm2050_vm15, %v4186_v0, %v2013_v26  ;;  %v1867_v3 = vadd.f32 %v4014_v22, %v1666_v49  ;;  %v4929_v49 = vld [vmem:[#allocation25_spill] sm:$0xff] }
 0x399   : > { %1821 = vrot.lane.b32.xlu0 %v1750_v46, %s2835_s18  ;;  %v4220_v55 = vadd.f32 %v1372_v19, %v1221_v54  ;;  %v1865_v54 = vadd.f32 %v1824_v10, %v1664_v37  ;;  %v1869_v28 = vadd.f32 %v1827_v27, %v1668_v60  ;;  %v2053_v36 = vsel %vm2050_vm15, %v4172_v57, %v4186_v0  ;;  %v4930_v27 = vld [vmem:[#allocation15_spill] sm:$0xff] }
 0x39a   : > { %2038 = vrot.lane.b32.xlu1 %v1972_v13, %s2836_s19  ;;  %v1226_v43 = vadd.f32 %v4036_v59, %v4152_v41  ;;  %v2094_v21 = vadd.f32 %v4172_v57, %v1867_v3  ;;  %v350_v57 = vmul.f32 %v3849_v62, %v3228_v14  ;;  %v352_v63 = vmul.f32 %v3865_v12, %v3228_v14 }
 0x39b   : > { %v1374_v48 = vpop.permute.xlu0 %1373  ;;  %v2092_v39 = vadd.f32 %v2051_v47, %v1865_v54  ;;  %v2096_v53 = vadd.f32 %v2054_v9, %v1869_v28  ;;  %v4933_v54 = vld [vmem:[#allocation26_spill] sm:$0xff]  ;;  %v4935_v9 = vld [vmem:[#allocation47_spill] sm:$0xff] }
 0x39c   : > { %v1404_v30 = vsel %vm1395_vm12, %v1372_v19, %v1374_v48  ;;  %v1376_v25 = vpop.permute.xlu1 %1375 }
 0x39d   : > { %v4240_v16 = vadd.f32 %v1404_v30, %v1222_v24  ;;  %2040 = vrot.lane.b32.xlu0 %v1973_v61, %s2836_s19  ;;  %v1405_v52 = vsel %vm1395_vm12, %v1374_v48, %v1376_v25  ;;  %v1866_v24 = vadd.f32 %v1825_v2, %v1665_v20  ;;  %v1225_v61 = vadd.f32 %v1182_v17, %v4925_v51  ;;  %v4927_v20 = vld [vmem:[#allocation14_spill] sm:$0xff]  ;;  %v4928_v2 = vld [vmem:[#allocation4_spill] sm:$0xff] }
 0x39e   : > { %v4253_v38 = vadd.f32 %v1405_v52, %v1223_v33  ;;  %2042 = vrot.lane.b32.xlu1 %v1974_v45, %s2836_s19  ;;  %v1663_v45 = vadd.f32 %v4922_v56, %v1436_v35  ;;  %v416_v30 = vmul.f32 %v4928_v2, %v352_v63  ;;  %v4931_v17 = vld [vmem:[#allocation46_spill] sm:$0xff] }
 0x39f   : > { %v1378_v46 = vpop.permute.xlu0 %1377  ;;  %v2093_v32 = vadd.f32 %v2052_v50, %v1866_v24  ;;  %v4932_v50 = vld [vmem:[#allocation45_spill] sm:$0xff]  ;;  %v4948_v2 = vld [vmem:[#allocation6_spill] sm:$0xff] }
 0x3a0   : > { %v4261_v13 = vadd.f32 %v1378_v46, %v1224_v34  ;;  %v1380_v33 = vpop.permute.xlu1 %1379  ;;  %v1868_v34 = vadd.f32 %v1826_v4, %v1667_v44  ;;  %v1864_v56 = vadd.f32 %v3998_v40, %v1663_v45  ;;  %v617_v25 = vadd.f32 %v4930_v27, %v416_v30  ;;  %v4934_v44 = vld [vmem:[#allocation62_spill] sm:$0xff]  ;;  %v4938_v45 = vld [vmem:[#allocation64_spill] sm:$0xff] }
 0x3a1   : > { %2044 = vrot.lane.b32.xlu0 %v1975_v29, %s2836_s19  ;;  %v1406_v26 = vsel %vm1395_vm12, %v1378_v46, %v1380_v33  ;;  %v2739_v1 = vpack.i.bf16 %v2093_v32, %v2092_v39  ;;  %v341_v4 = vmul.f32 %v4934_v44, %v3238_v7  ;;  %v4937_v32 = vld [vmem:[#allocation50_spill] sm:$0xff]  ;;  %v343_v3 = vmul.f32 %v4938_v45, %v3238_v7  ;;  %v4956_v45 = vld [vmem:[#allocation19_spill] sm:$0xff] }
 0x3a2   : > { %v4273_v23 = vadd.f32 %v1406_v26, %v1225_v61  ;;  %2046 = vrot.lane.b32.xlu1 %v1976_v42, %s2836_s19  ;;  %v2095_v0 = vadd.f32 %v2053_v36, %v1868_v34  ;;  %v2091_v59 = vadd.f32 %v4133_v31, %v1864_v56  ;;  %v846_v24 = vadd.f32 %v4933_v54, %v617_v25  ;;  %v4936_v61 = vld [vmem:[#allocation48_spill] sm:$0xff]  ;;  %v4939_v36 = vld [vmem:[#allocation63_spill] sm:$0xff]  ;;  %v4942_v56 = vld [vmem:[#allocation65_spill] sm:$0xff] }
 0x3a3   : > { %v1382_v29 = vpop.permute.xlu0 %1381  ;;  %v342_v26 = vmul.f32 %v4939_v36, %v3228_v14  ;;  %v4949_v25 = vld [vmem:[#allocation10_spill] sm:$0xff]  ;;  %v4957_v36 = vld [vmem:[#allocation56_spill] sm:$0xff] }
 0x3a4   : > { %v1407_v22 = vsel %vm1395_vm12, %v1380_v33, %v1382_v29  ;;  %v4281_v35 = vpop.permute.xlu1 %1787  ;;  %v2744_v41 = vpack.i.bf16 %v2096_v53, %v2095_v0  ;;  %v2749_v40 = vpack.i.bf16 %v2094_v21, %v2091_v59  ;;  %v1072_v39 = vadd.f32 %v4936_v61, %v846_v24  ;;  %v4941_v53 = vld [vmem:[#allocation7_spill] sm:$0xff]  ;;  %v4943_v0 = vld [vmem:[#allocation2_spill] sm:$0xff] }
 0x3a5   : > { %v4279_v19 = vadd.f32 %v1407_v22, %v1226_v43  ;;  %2048 = vrot.lane.b32.xlu0 %v1977_v8, %s2836_s19  ;;  %v4926_v8 = vld [vmem:[#allocation5_spill] sm:$0xff]  ;;  %v4940_v43 = vld [vmem:[#allocation8_spill] sm:$0xff]  ;;  %v344_v22 = vmul.f32 %v4942_v56, %v3228_v14  ;;  %v400_v59 = vmul.f32 %v4943_v0, %v341_v4  ;;  %v558_v30 = vsel %vm553_vm6, %v4948_v2, %v4941_v53  ;;  %v4954_v4 = vld [vmem:[#allocation18_spill] sm:$0xff] }
 0x3a6   : > { %2740 = vrot.lane.b32.xlu1 %v2739_v1, %s2832_s6  ;;  %v413_v37 = vmul.f32 %v4926_v8, %v350_v57  ;;  %v559_v29 = vsel %vm553_vm6, %v4941_v53, %v4940_v43  ;;  %v4945_v57 = vld [vmem:[#allocation3_spill] sm:$0xff]  ;;  %v399_v27 = vmul.f32 %v4943_v0, %v3230_v6 }
 0x3a7   : > { %v4286_v42 = vpop.permute.xlu0 %1789  ;;  %v402_v8 = vmul.f32 %v4945_v57, %v3230_v6  ;;  %v403_v63 = vmul.f32 %v4945_v57, %v343_v3  ;;  %v4963_v2 = vld [vmem:[#allocation71_spill] sm:$0xff] }
 0x3a8   : > { %v4288_v11 = vpop.permute.xlu1 %1791  ;;  %v614_v48 = vadd.f32 %v4927_v20, %v413_v37  ;;  %v4946_v37 = vld [vmem:[#allocation20_spill] sm:$0xff]  ;;  %v4947_v20 = vld [vmem:[#allocation17_spill] sm:$0xff]  ;;  %v600_v61 = vadd.f32 %v558_v30, %v399_v27 }
 0x3a9   : > { %2745 = vrot.lane.b32.xlu0 %v2744_v41, %s2832_s6  ;;  %v4944_v41 = vld [vmem:[#allocation49_spill] sm:$0xff]  ;;  %v787_v6 = vsel %vm782_vm7, %v4954_v4, %v4947_v20  ;;  %v4968_v4 = vld [vmem:[#allocation38_spill] sm:$0xff] }
 0x3aa   : > { %2750 = vrot.lane.b32.xlu1 %v2749_v40, %s2832_s6  ;;  %v843_v5 = vadd.f32 %v4929_v49, %v614_v48  ;;  %v788_v48 = vsel %vm782_vm7, %v4947_v20, %v4946_v37  ;;  %v401_v49 = vmul.f32 %v4943_v0, %v342_v26  ;;  %v4958_v26 = vld [vmem:[#allocation55_spill] sm:$0xff] }
 0x3ab   : > { %v4294_v58 = vpop.permute.xlu0 %1793 }
 0x3ac   : > { %v4297_v31 = vpop.permute.xlu1 %1795  ;;  %v1069_v47 = vadd.f32 %v4931_v17, %v843_v5  ;;  %v601_v5 = vadd.f32 %v559_v29, %v400_v59  ;;  %v4950_v17 = vld [vmem:[#allocation9_spill] sm:$0xff]  ;;  %v602_v24 = vadd.f32 %v4940_v43, %v401_v49  ;;  %v829_v59 = vadd.f32 %v787_v6, %v600_v61 }
 0x3ad   : > { %v4959_v29 = vld [vmem:[#allocation21_spill] sm:$0xff] }
 0x3ae   : > { %v831_v53 = vadd.f32 %v4946_v37, %v602_v24  ;;  %v4964_v37 = vld [vmem:[#allocation33_spill] sm:$0xff] }
 0x3af   : > { %v4302_v10 = vpop.permute.xlu0 %1797  ;;  %v4967_v24 = vld [vmem:[#allocation77_spill] sm:$0xff] }
 0x3b0   : > { %v1170_v62 = vpop.permute.xlu1 %1169 }
 0x3b1   : > { %v4309_v52 = vadd.f32 %v1170_v62, %v4932_v50  ;;  %v4951_v50 = vld [vmem:[#allocation35_spill] sm:$0xff] }
 0x3b3   : > { %v1172_v60 = vpop.permute.xlu0 %1171 }
 0x3b4   : > { %v1183_v46 = vsel %vm331_vm5, %v1170_v62, %v1172_v60  ;;  %v4313_v12 = vadd.f32 %v1172_v60, %v1069_v47  ;;  %v1174_v51 = vpop.permute.xlu1 %1173  ;;  %v560_v47 = vsel %vm553_vm6, %v4950_v17, %v4949_v25  ;;  %v4952_v60 = vld [vmem:[#allocation34_spill] sm:$0xff] }
 0x3b5   : > { %v4318_v28 = vadd.f32 %v1183_v46, %v4935_v9  ;;  %v4322_v33 = vadd.f32 %v1174_v51, %v4937_v32  ;;  %v1014_v54 = vsel %vm1008_vm8, %v4952_v60, %v4951_v50  ;;  %v4953_v46 = vld [vmem:[#allocation11_spill] sm:$0xff]  ;;  %v830_v9 = vadd.f32 %v788_v48, %v601_v5  ;;  %v4955_v32 = vld [vmem:[#allocation22_spill] sm:$0xff]  ;;  %v4962_v48 = vld [vmem:[#allocation72_spill] sm:$0xff] }
 0x3b6   : > { %v561_v44 = vsel %vm553_vm6, %v4949_v25, %v4953_v46  ;;  %v789_v3 = vsel %vm782_vm7, %v4956_v45, %v4955_v32  ;;  %v603_v43 = vadd.f32 %v560_v47, %v402_v8  ;;  %v790_v56 = vsel %vm782_vm7, %v4955_v32, %v4959_v29  ;;  %v4965_v47 = vld [vmem:[#allocation73_spill] sm:$0xff] }
 0x3b7   : > { %v1176_v34 = vpop.permute.xlu0 %1175  ;;  %v604_v0 = vadd.f32 %v561_v44, %v403_v63  ;;  %v1400_v30 = vsel %vm1395_vm12, %v4963_v2, %v4962_v48  ;;  %v1013_v49 = vsel %vm1008_vm8, %v4964_v37, %v4952_v60  ;;  %v1057_v5 = vadd.f32 %v4951_v50, %v831_v53 }
 0x3b8   : > { %v1184_v1 = vsel %vm331_vm5, %v1174_v51, %v1176_v34  ;;  %v4334_v21 = vadd.f32 %v1176_v34, %v1072_v39  ;;  %v4340_v7 = vpop.permute.xlu1 %1598  ;;  %v1179_v34 = vsel %vm331_vm5, %v4958_v26, %v4957_v36  ;;  %v832_v8 = vadd.f32 %v789_v3, %v603_v43  ;;  %v4969_v3 = vld [vmem:[#allocation57_spill] sm:$0xff]  ;;  %v4970_v43 = vld [vmem:[#allocation58_spill] sm:$0xff] }
 0x3b9   : > { %v4338_v40 = vadd.f32 %v1184_v1, %v4944_v41  ;;  %v4349_v14 = vadd.f32 %v4340_v7, %v4220_v55  ;;  %v404_v55 = vmul.f32 %v4945_v57, %v344_v22  ;;  %v1056_v22 = vadd.f32 %v1014_v54, %v830_v9  ;;  %v4960_v41 = vld [vmem:[#allocation37_spill] sm:$0xff]  ;;  %v4961_v57 = vld [vmem:[#allocation36_spill] sm:$0xff]  ;;  %v4966_v54 = vld [vmem:[#allocation78_spill] sm:$0xff] }
 0x3ba   : > { %v1015_v20 = vsel %vm1008_vm8, %v4961_v57, %v4960_v41  ;;  %v833_v17 = vadd.f32 %v790_v56, %v604_v0  ;;  %v1016_v60 = vsel %vm1008_vm8, %v4960_v41, %v4968_v4  ;;  %v1217_v50 = vadd.f32 %v4957_v36, %v1057_v5  ;;  %v4971_v41 = vld [vmem:[#allocation74_spill] sm:$0xff] }
 0x3bb   : > { %v4356_v62 = vpop.permute.xlu0 %1600  ;;  %v605_v39 = vadd.f32 %v4953_v46, %v404_v55  ;;  %v1216_v27 = vadd.f32 %v1179_v34, %v1056_v22  ;;  %v1401_v55 = vsel %vm1395_vm12, %v4962_v48, %v4965_v47  ;;  %v1627_v46 = vsel %vm1622_vm13, %v4967_v24, %v4966_v54 }
 0x3bc   : > { %v4374_v51 = vpop.permute.xlu1 %1602  ;;  %v1058_v44 = vadd.f32 %v1015_v20, %v832_v8  ;;  %v1055_v61 = vadd.f32 %v1013_v49, %v829_v59  ;;  %v1628_v32 = vsel %vm1622_vm13, %v4966_v54, %v4077_v15  ;;  %v1828_v45 = vsel %vm1823_vm14, %v4281_v35, %v4286_v42  ;;  %v4972_v20 = vld [vmem:[#allocation75_spill] sm:$0xff] }
 0x3bd   : > { %v834_v63 = vadd.f32 %v4959_v29, %v605_v39  ;;  %v1443_v6 = vadd.f32 %v1400_v30, %v1216_v27  ;;  %v1180_v36 = vsel %vm331_vm5, %v4969_v3, %v4970_v43  ;;  %v1444_v53 = vadd.f32 %v1401_v55, %v1217_v50  ;;  %v4973_v27 = vld [vmem:[#allocation76_spill] sm:$0xff] }
 0x3be   : > { %v1218_v34 = vadd.f32 %v4969_v3, %v1058_v44  ;;  %v1059_v22 = vadd.f32 %v1016_v60, %v833_v17  ;;  %v1215_v0 = vadd.f32 %v4958_v26, %v1055_v61  ;;  %v1829_v15 = vsel %vm1823_vm14, %v4286_v42, %v4288_v11  ;;  %v4974_v11 = vld [vmem:[#allocation16_spill] sm:$0xff] }
 0x3bf   : > { %v4387_v1 = vpop.permute.xlu0 %1604  ;;  %v1060_v39 = vadd.f32 %v4968_v4, %v834_v63  ;;  %v1670_v29 = vadd.f32 %v1627_v46, %v1443_v6  ;;  %v1402_v48 = vsel %vm1395_vm12, %v4971_v41, %v4972_v20  ;;  %v1671_v30 = vadd.f32 %v1628_v32, %v1444_v53  ;;  %v4975_v44 = vld [vmem:[#allocation12_spill] sm:$0xff] }
 0x3c0   : > { %v4399_v25 = vpop.permute.xlu1 %1606  ;;  %v1445_v57 = vadd.f32 %v4971_v41, %v1218_v34  ;;  %v1219_v49 = vadd.f32 %v1180_v36, %v1059_v22  ;;  %v1442_v5 = vadd.f32 %v4963_v2, %v1215_v0  ;;  %v1403_v26 = vsel %vm1395_vm12, %v4972_v20, %v4973_v27 }
 0x3c1   : > { %v1220_v59 = vadd.f32 %v4970_v43, %v1060_v39  ;;  %v1871_v8 = vadd.f32 %v1828_v45, %v1670_v29  ;;  %v1629_v17 = vsel %vm1622_vm13, %v4092_v18, %v4974_v11  ;;  %v1872_v47 = vadd.f32 %v1829_v15, %v1671_v30 }
 0x3c2   : > { %v1672_v42 = vadd.f32 %v4092_v18, %v1445_v57  ;;  %v1446_v46 = vadd.f32 %v1402_v48, %v1219_v49  ;;  %v1630_v2 = vsel %vm1622_vm13, %v4974_v11, %v4975_v44  ;;  %v1669_v50 = vadd.f32 %v4967_v24, %v1442_v5 }
 0x3c3   : > { %v4412_v9 = vpop.permute.xlu0 %1608  ;;  %v1447_v60 = vadd.f32 %v1403_v26, %v1220_v59  ;;  %v1830_v18 = vsel %vm1823_vm14, %v4294_v58, %v4297_v31  ;;  %v1831_v45 = vsel %vm1823_vm14, %v4297_v31, %v4302_v10 }
 0x3c4   : > { %v2015_v56 = vpop.permute.xlu1 %2014  ;;  %v1873_v6 = vadd.f32 %v4294_v58, %v1672_v42  ;;  %v1673_v32 = vadd.f32 %v1629_v17, %v1446_v46  ;;  %v1870_v34 = vadd.f32 %v4281_v35, %v1669_v50  ;;  %v1632_v46 = vsel %vm1622_vm13, %v4356_v62, %v4374_v51 }
 0x3c5   : > { %v1674_v3 = vadd.f32 %v1630_v2, %v1447_v60  ;;  %v1677_v50 = vadd.f32 %v1632_v46, %v4253_v38 }
 0x3c6   : > { %v1874_v29 = vadd.f32 %v1830_v18, %v1673_v32  ;;  %v2097_v0 = vadd.f32 %v2015_v56, %v1870_v34 }
 0x3c7   : > { %v2017_v37 = vpop.permute.xlu0 %2016  ;;  %v1875_v22 = vadd.f32 %v1831_v45, %v1674_v3 }
 0x3c8   : > { %v2055_v63 = vsel %vm2050_vm15, %v2015_v56, %v2017_v37  ;;  %v2019_v54 = vpop.permute.xlu1 %2018 }
 0x3c9   : > { %v2098_v55 = vadd.f32 %v2055_v63, %v1871_v8  ;;  %v2056_v4 = vsel %vm2050_vm15, %v2017_v37, %v2019_v54 }
 0x3ca   : > { %v2099_v61 = vadd.f32 %v2056_v4, %v1872_v47 }
 0x3cb   : > { %v2021_v39 = vpop.permute.xlu0 %2020 }
 0x3cc   : > { %v2754_v43 = vpack.i.bf16 %v2099_v61, %v2098_v55  ;;  %v2100_v36 = vadd.f32 %v2021_v39, %v1873_v6  ;;  %v2023_v53 = vpop.permute.xlu1 %2022  ;;  %v1631_v55 = vsel %vm1622_vm13, %v4340_v7, %v4356_v62  ;;  %v1678_v7 = vadd.f32 %v4387_v1, %v4261_v13 }
 0x3cd   : > { %v2057_v24 = vsel %vm2050_vm15, %v2021_v39, %v2023_v53  ;;  %v1676_v2 = vadd.f32 %v1631_v55, %v4240_v16  ;;  %v1633_v62 = vsel %vm1622_vm13, %v4387_v1, %v4399_v25  ;;  %v1634_v16 = vsel %vm1622_vm13, %v4399_v25, %v4412_v9 }
 0x3ce   : > { %2755 = vrot.lane.b32.xlu0 %v2754_v43, %s2832_s6  ;;  %v2764_v15 = vpack.i.bf16 %v2100_v36, %v2097_v0  ;;  %v2101_v41 = vadd.f32 %v2057_v24, %v1874_v29  ;;  %v1679_v24 = vadd.f32 %v1633_v62, %v4273_v23  ;;  %v1680_v29 = vadd.f32 %v1634_v16, %v4279_v19 }
 0x3cf   : > { %v2025_v59 = vpop.permute.xlu0 %2024 }
 0x3d0   : > { %v2058_v58 = vsel %vm2050_vm15, %v2023_v53, %v2025_v59  ;;  %v4459_v31 = vpop.permute.xlu1 %1383 }
 0x3d1   : > { %v2102_v57 = vadd.f32 %v2058_v58, %v1875_v22 }
 0x3d2   : > { %2765 = vrot.lane.b32.xlu0 %v2764_v15, %s2832_s6 }
 0x3d3   : > { %v2759_v10 = vpack.i.bf16 %v2102_v57, %v2101_v41  ;;  %v4462_v35 = vpop.permute.xlu0 %1385 }
 0x3d4   : > { %v4464_v20 = vpop.permute.xlu1 %1387 }
 0x3d5   : > { %2760 = vrot.lane.b32.xlu1 %v2759_v10, %s2832_s6 }
 0x3d7   : > { %v4467_v56 = vpop.permute.xlu0 %1389 }
 0x3d8   : > { %v4469_v48 = vpop.permute.xlu1 %1391 }
 0x3db   : > { %v4471_v30 = vpop.permute.xlu0 %1393 }
 0x3dc   : > { %v1800_v8 = vpop.permute.xlu1 %1799 }
 0x3dd   : > { %v1876_v38 = vadd.f32 %v1800_v8, %v4349_v14 }
 0x3df   : > { %v1802_v37 = vpop.permute.xlu0 %1801 }
 0x3e0   : > { %v1804_v49 = vpop.permute.xlu1 %1803  ;;  %v1832_v44 = vsel %vm1823_vm14, %v1800_v8, %v1802_v37 }
 0x3e1   : > { %v1833_v60 = vsel %vm1823_vm14, %v1802_v37, %v1804_v49  ;;  %v1877_v6 = vadd.f32 %v1832_v44, %v1676_v2  ;;  %v1408_v49 = vsel %vm1395_vm12, %v4459_v31, %v4462_v35 }
 0x3e2   : > { %v1878_v51 = vadd.f32 %v1833_v60, %v1677_v50  ;;  %v1455_v55 = vadd.f32 %v1408_v49, %v4318_v28  ;;  %v1410_v28 = vsel %vm1395_vm12, %v4467_v56, %v4469_v48 }
 0x3e3   : > { %v1806_v5 = vpop.permute.xlu0 %1805 }
 0x3e4   : > { %v1808_v27 = vpop.permute.xlu1 %1807  ;;  %v1879_v45 = vadd.f32 %v1806_v5, %v1678_v7 }
 0x3e5   : > { %v1834_v43 = vsel %vm1823_vm14, %v1806_v5, %v1808_v27 }
 0x3e6   : > { %v1880_v9 = vadd.f32 %v1834_v43, %v1679_v24 }
 0x3e7   : > { %v1810_v26 = vpop.permute.xlu0 %1809 }
 0x3e8   : > { %v4473_v63 = vpop.permute.xlu1 %1610  ;;  %v1835_v36 = vsel %vm1823_vm14, %v1808_v27, %v1810_v26  ;;  %v1409_v27 = vsel %vm1395_vm12, %v4462_v35, %v4464_v20  ;;  %v1457_v35 = vadd.f32 %v4467_v56, %v4322_v33 }
 0x3e9   : > { %v1881_v59 = vadd.f32 %v1835_v36, %v1680_v29 }
 0x3eb   : > { %v1613_v42 = vpop.permute.xlu0 %1612 }
 0x3ec   : > { %v1615_v11 = vpop.permute.xlu1 %1614  ;;  %v1635_v26 = vsel %vm1622_vm13, %v4473_v63, %v1613_v42 }
 0x3ed   : > { %v1636_v44 = vsel %vm1622_vm13, %v1613_v42, %v1615_v11  ;;  %v1682_v60 = vadd.f32 %v1635_v26, %v1455_v55 }
 0x3ef   : > { %v4475_v17 = vpop.permute.xlu0 %1616 }
 0x3f0   : > { %v4477_v47 = vpop.permute.xlu1 %1618 }
 0x3f1   : > { %v1637_v33 = vsel %vm1622_vm13, %v4475_v17, %v4477_v47 }
 0x3f3   : > { %v4482_v54 = vpop.permute.xlu0 %1620 }
 0x3f4   : > { %v2027_v4 = vpop.permute.xlu1 %2026 }
 0x3f5   : > { %v2103_v53 = vadd.f32 %v2027_v4, %v1876_v38 }
 0x3f7   : > { %v2029_v61 = vpop.permute.xlu0 %2028 }
 0x3f8   : > { %v2059_v39 = vsel %vm2050_vm15, %v2027_v4, %v2029_v61  ;;  %v2031_v18 = vpop.permute.xlu1 %2030  ;;  %v1456_v4 = vadd.f32 %v1409_v27, %v4313_v12  ;;  %v1411_v12 = vsel %vm1395_vm12, %v4469_v48, %v4471_v30  ;;  %v1458_v30 = vadd.f32 %v1410_v28, %v4338_v40  ;;  %v2144_v28 = vld [vmem:[%s4755_s3 + $0x68] sm:$0xff] }
 0x3f9   : > { %v2104_v32 = vadd.f32 %v2059_v39, %v1877_v6  ;;  %v2060_v3 = vsel %vm2050_vm15, %v2029_v61, %v2031_v18  ;;  %v1454_v6 = vadd.f32 %v4459_v31, %v4309_v52  ;;  %v1684_v52 = vadd.f32 %v4475_v17, %v1457_v35  ;;  %v2142_v35 = vld [vmem:[%s4755_s3 + $0x58] sm:$0xff] }
 0x3fa   : > { %v2105_v34 = vadd.f32 %v2060_v3, %v1878_v51  ;;  %v1683_v61 = vadd.f32 %v1636_v44, %v1456_v4  ;;  %v1638_v51 = vsel %vm1622_vm13, %v4477_v47, %v4482_v54  ;;  %v2136_v44 = vld [vmem:[%s4755_s3 + $0x28] sm:$0xff]  ;;  %v2138_v4 = vld [vmem:[%s4755_s3 + $0x38] sm:$0xff] }
 0x3fb   : > { %v2033_v13 = vpop.permute.xlu0 %2032  ;;  %v1681_v7 = vadd.f32 %v4473_v63, %v1454_v6  ;;  %v1459_v63 = vadd.f32 %v1411_v12, %v4334_v21  ;;  %v2139_v6 = vld [vmem:[%s4755_s3 + $0x40] sm:$0xff] }
 0x3fc   : > { %v2106_v1 = vadd.f32 %v2033_v13, %v1879_v45  ;;  %v2769_v22 = vpack.i.bf16 %v2105_v34, %v2104_v32  ;;  %v2035_v0 = vpop.permute.xlu1 %2034 }
 0x3fd   : > { %v2061_v14 = vsel %vm2050_vm15, %v2033_v13, %v2035_v0  ;;  %v1685_v13 = vadd.f32 %v1637_v33, %v1458_v30  ;;  %v1686_v43 = vadd.f32 %v1638_v51, %v1459_v63 }
 0x3fe   : > { %v2779_v25 = vpack.i.bf16 %v2106_v1, %v2103_v53  ;;  %2770 = vrot.lane.b32.xlu1 %v2769_v22, %s2832_s6  ;;  %v2107_v41 = vadd.f32 %v2061_v14, %v1880_v9 }
 0x3ff   : > { %v2037_v58 = vpop.permute.xlu0 %2036 }
 0x400   : > { %v2062_v15 = vsel %vm2050_vm15, %v2035_v0, %v2037_v58  ;;  %v1812_v10 = vpop.permute.xlu1 %1811 }
 0x401   : > { %v2108_v57 = vadd.f32 %v2062_v15, %v1881_v59  ;;  %v1882_v32 = vadd.f32 %v1812_v10, %v1681_v7 }
 0x402   : > { %2780 = vrot.lane.b32.xlu1 %v2779_v25, %s2832_s6 }
 0x403   : > { %v2774_v8 = vpack.i.bf16 %v2108_v57, %v2107_v41  ;;  %v1814_v23 = vpop.permute.xlu0 %1813  ;;  %v2132_v41 = vld [vmem:[%s4755_s3 + $0x8] sm:$0xff] }
 0x404   : > { %v1816_v19 = vpop.permute.xlu1 %1815  ;;  %v1836_v2 = vsel %vm1823_vm14, %v1812_v10, %v1814_v23 }
 0x405   : > { %2775 = vrot.lane.b32.xlu0 %v2774_v8, %s2832_s6  ;;  %v1837_v20 = vsel %vm1823_vm14, %v1814_v23, %v1816_v19  ;;  %v1883_v42 = vadd.f32 %v1836_v2, %v1682_v60  ;;  %v2131_v23 = vld [vmem:[%s4755_s3] sm:$0xff]  ;;  %v2137_v60 = vld [vmem:[%s4755_s3 + $0x30] sm:$0xff] }
 0x406   : > { %v1884_v39 = vadd.f32 %v1837_v20, %v1683_v61  ;;  %v2135_v2 = vld [vmem:[%s4755_s3 + $0x20] sm:$0xff]  ;;  %v2141_v20 = vld [vmem:[%s4755_s3 + $0x50] sm:$0xff] }
 0x407   : > { %v1818_v37 = vpop.permute.xlu0 %1817  ;;  %v2143_v61 = vld [vmem:[%s4755_s3 + $0x60] sm:$0xff] }
 0x408   : > { %v1820_v5 = vpop.permute.xlu1 %1819  ;;  %v1885_v18 = vadd.f32 %v1818_v37, %v1684_v52 }
 0x409   : > { %v1838_v45 = vsel %vm1823_vm14, %v1818_v37, %v1820_v5 }
 0x40a   : > { %v1886_v1 = vadd.f32 %v1838_v45, %v1685_v13 }
 0x40b   : > { %v1822_v46 = vpop.permute.xlu0 %1821 }
 0x40c   : > { %v2039_v50 = vpop.permute.xlu1 %2038  ;;  %v1839_v17 = vsel %vm1823_vm14, %v1820_v5, %v1822_v46  ;;  %v2134_v5 = vld [vmem:[%s4755_s3 + $0x18] sm:$0xff]  ;;  %v2133_v46 = vld [vmem:[%s4755_s3 + $0x10] sm:$0xff] }
 0x40d   : > { %v2109_v3 = vadd.f32 %v2039_v50, %v1882_v32  ;;  %v1887_v24 = vadd.f32 %v1839_v17, %v1686_v43 }
 0x40f   : > { %v2041_v11 = vpop.permute.xlu0 %2040 }
 0x410   : > { %v2063_v31 = vsel %vm2050_vm15, %v2039_v50, %v2041_v11  ;;  %v2043_v56 = vpop.permute.xlu1 %2042  ;;  %v2140_v50 = vld [vmem:[%s4755_s3 + $0x48] sm:$0xff] }
 0x411   : > { %v2110_v62 = vadd.f32 %v2063_v31, %v1883_v42  ;;  %v2064_v48 = vsel %vm2050_vm15, %v2041_v11, %v2043_v56  ;;  %v2146_v42 = vld [vmem:[%s4755_s3 + $0x78] sm:$0xff]  ;;  %v2145_v11 = vld [vmem:[%s4755_s3 + $0x70] sm:$0xff] }
 0x412   : > { %v2111_v16 = vadd.f32 %v2064_v48, %v1884_v39 }
 0x413   : > { %v2045_v38 = vpop.permute.xlu0 %2044 }
 0x414   : > { %v2112_v34 = vadd.f32 %v2045_v38, %v1885_v18  ;;  %v2784_v36 = vpack.i.bf16 %v2111_v16, %v2110_v62  ;;  %v2047_v47 = vpop.permute.xlu1 %2046 }
 0x415   : > { %v2065_v53 = vsel %vm2050_vm15, %v2045_v38, %v2047_v47 }
 0x416   : > { %v2794_v54 = vpack.i.bf16 %v2112_v34, %v2109_v3  ;;  %2785 = vrot.lane.b32.xlu0 %v2784_v36, %s2832_s6  ;;  %v2113_v29 = vadd.f32 %v2065_v53, %v1886_v1 }
 0x417   : > { %v2049_v21 = vpop.permute.xlu0 %2048 }
 0x418   : > { %v2066_v40 = vsel %vm2050_vm15, %v2047_v47, %v2049_v21  ;;  %v2741_v0 = vpop.permute.xlu1 %2740 }
 0x419   : > { %v2114_v22 = vadd.f32 %v2066_v40, %v1887_v24  ;;  %v2743_v25 = vunpack.i.h.bf16 %v2741_v0  ;;  %v2742_v14 = vunpack.i.l.bf16 %v2741_v0 }
 0x41a   : > { %2795 = vrot.lane.b32.xlu0 %v2794_v54, %s2832_s6 }
 0x41b   : > { %v2789_v9 = vpack.i.bf16 %v2114_v22, %v2113_v29  ;;  %v2746_v59 = vpop.permute.xlu0 %2745  ;;  %v2300_v19 = vsel %vm1892_vm11, %v2742_v14, %v2743_v25 }
 0x41c   : > { %v2748_v58 = vunpack.i.h.bf16 %v2746_v59  ;;  %v2747_v15 = vunpack.i.l.bf16 %v2746_v59  ;;  %v2751_v57 = vpop.permute.xlu1 %2750 }
 0x41d   : > { %2790 = vrot.lane.b32.xlu1 %v2789_v9, %s2832_s6  ;;  %v2753_v10 = vunpack.i.h.bf16 %v2751_v57  ;;  %v2752_v8 = vunpack.i.l.bf16 %v2751_v57 }
 0x41e   : > { %v2302_v37 = vsel %vm1892_vm11, %v2747_v15, %v2748_v58  ;;  %2154 = vperm.xlu0 %2707, %v2132_v41  }
 0x41f   : > { %v2661_v49 = vpack.c.bf16 %v2302_v37, %v2300_v19  ;;  %v2299_v27 = vsel %vm1892_vm11, %v2752_v8, %v2742_v14  ;;  %v2301_v26 = vsel %vm1892_vm11, %v2753_v10, %v2747_v15  ;;  %v2115_v37 = vld [vmem:[%s4754_s2] sm:$0xff] }
 0x420   : > { %v2663_v55 = vpack.c.bf16 %v2301_v26, %v2299_v27  ;;  %v2116_v27 = vld [vmem:[%s4754_s2 + $0x8] sm:$0xff] }
 0x421   : > { %2149 = vperm.xlu1 %2708, %v2131_v23   ;;  %2662 = vmatprep.subr.bf16.mxu0 %v2661_v49  ;;  %v2124_v26 = vld [vmem:[%s4754_s2 + $0x48] sm:$0xff] }
 0x422   : > { %2677 = vmatprep.subr.bf16.mxu1 %v2661_v49  ;;  %2164 = vperm.xlu0 %2707, %v2134_v5   ;;  %v2123_v49 = vld [vmem:[%s4754_s2 + $0x40] sm:$0xff]  ;;  %v4976_v5 = vmov 0.0  }
 0x423   : > { %2664 = vmatpush1.bf16.msra.mxu0 %v2663_v55  ;;  %2681 = vmatpush1.bf16.msra.mxu1 %v2663_v55  ;;  %v2117_v55 = vld [vmem:[%s4754_s2 + $0x10] sm:$0xff] }
 0x425   : > { %2159 = vperm.xlu1 %2708, %v2133_v46   ;;  %v2125_v46 = vld [vmem:[%s4754_s2 + $0x50] sm:$0xff] }
 0x426   : > { %2174 = vperm.xlu0 %2707, %v2136_v44   ;;  %v2118_v44 = vld [vmem:[%s4754_s2 + $0x18] sm:$0xff] }
 0x429   : > { %2169 = vperm.xlu1 %2708, %v2135_v2   ;;  %v2126_v2 = vld [vmem:[%s4754_s2 + $0x58] sm:$0xff] }
 0x42a   : > { %2184 = vperm.xlu0 %2707, %v2138_v4   ;;  %v2119_v4 = vld [vmem:[%s4754_s2 + $0x20] sm:$0xff] }
 0x42d   : > { %2179 = vperm.xlu1 %2708, %v2137_v60   ;;  %v2127_v60 = vld [vmem:[%s4754_s2 + $0x60] sm:$0xff] }
 0x42e   : > { %2194 = vperm.xlu0 %2707, %v2140_v50   ;;  %v2120_v50 = vld [vmem:[%s4754_s2 + $0x28] sm:$0xff] }
 0x431   : > { %2189 = vperm.xlu1 %2708, %v2139_v6   ;;  %v2128_v6 = vld [vmem:[%s4754_s2 + $0x68] sm:$0xff] }
 0x432   : > { %2204 = vperm.xlu0 %2707, %v2142_v35   ;;  %v2121_v35 = vld [vmem:[%s4754_s2 + $0x30] sm:$0xff] }
 0x435   : > { %2199 = vperm.xlu1 %2708, %v2141_v20   ;;  %v2129_v20 = vld [vmem:[%s4754_s2 + $0x70] sm:$0xff] }
 0x436   : > { %2214 = vperm.xlu0 %2707, %v2144_v28   ;;  %v2122_v28 = vld [vmem:[%s4754_s2 + $0x38] sm:$0xff] }
 0x439   : > { %2209 = vperm.xlu1 %2708, %v2143_v61   ;;  %v2130_v61 = vld [vmem:[%s4754_s2 + $0x78] sm:$0xff] }
 0x43a   : > { %2224 = vperm.xlu0 %2707, %v2146_v42  }
 0x43d   : > { %2219 = vperm.xlu1 %2708, %v2145_v11  }
 0x440   : > { %v2756_v12 = vpop.permute.xlu0 %2755 }
 0x441   : > { %v2758_v52 = vunpack.i.h.bf16 %v2756_v12  ;;  %v2757_v31 = vunpack.i.l.bf16 %v2756_v12 }
 0x443   : > { %v2304_v32 = vsel %vm1892_vm11, %v2757_v31, %v2758_v52 }
 0x444   : > { %v2766_v7 = vpop.permute.xlu0 %2765 }
 0x445   : > { %v2767_v33 = vunpack.i.l.bf16 %v2766_v7  ;;  %v2768_v62 = vunpack.i.h.bf16 %v2766_v7 }
 0x447   : > { %v2761_v39 = vpop.permute.xlu1 %2760  ;;  %v2303_v48 = vsel %vm1892_vm11, %v2767_v33, %v2757_v31 }
 0x448   : > { %v2763_v56 = vunpack.i.h.bf16 %v2761_v39  ;;  %v2762_v51 = vunpack.i.l.bf16 %v2761_v39 }
 0x44a   : > { %v2306_v18 = vsel %vm1892_vm11, %v2762_v51, %v2763_v56  ;;  %v2305_v30 = vsel %vm1892_vm11, %v2768_v62, %v2762_v51 }
 0x44b   : > { %v2665_v63 = vpack.c.bf16 %v2306_v18, %v2304_v32  ;;  %v2667_v16 = vpack.c.bf16 %v2305_v30, %v2303_v48 }
 0x44d   : > { %2666 = vmatprep.subr.bf16.mxu0 %v2665_v63  ;;  %2678 = vmatprep.subr.bf16.mxu1 %v2665_v63 }
 0x44e   : > { %2668 = vmatpush1.bf16.msra.mxu0 %v2667_v16  ;;  %2682 = vmatpush1.bf16.msra.mxu1 %v2667_v16 }
 0x470   : > { %v2771_v38 = vpop.permute.xlu1 %2770 }
 0x471   : > { %v2773_v17 = vunpack.i.h.bf16 %v2771_v38  ;;  %v2772_v3 = vunpack.i.l.bf16 %v2771_v38 }
 0x473   : > { %v2308_v54 = vsel %vm1892_vm11, %v2772_v3, %v2773_v17 }
 0x474   : > { %v2781_v45 = vpop.permute.xlu1 %2780 }
 0x475   : > { %v2782_v34 = vunpack.i.l.bf16 %v2781_v45  ;;  %v2783_v43 = vunpack.i.h.bf16 %v2781_v45 }
 0x477   : > { %v2776_v13 = vpop.permute.xlu0 %2775  ;;  %v2307_v1 = vsel %vm1892_vm11, %v2782_v34, %v2772_v3 }
 0x478   : > { %v2778_v36 = vunpack.i.h.bf16 %v2776_v13  ;;  %v2777_v47 = vunpack.i.l.bf16 %v2776_v13 }
 0x47a   : > { %v2310_v53 = vsel %vm1892_vm11, %v2777_v47, %v2778_v36  ;;  %v2309_v24 = vsel %vm1892_vm11, %v2783_v43, %v2777_v47 }
 0x47b   : > { %v2669_v21 = vpack.c.bf16 %v2310_v53, %v2308_v54  ;;  %v2671_v40 = vpack.c.bf16 %v2309_v24, %v2307_v1 }
 0x47d   : > { %2670 = vmatprep.subr.bf16.mxu0 %v2669_v21  ;;  %2679 = vmatprep.subr.bf16.mxu1 %v2669_v21 }
 0x47e   : > { %2672 = vmatpush1.bf16.msra.mxu0 %v2671_v40  ;;  %2683 = vmatpush1.bf16.msra.mxu1 %v2671_v40 }
 0x488   : > { %v2786_v29 = vpop.permute.xlu0 %2785 }
 0x489   : > { %v2788_v0 = vunpack.i.h.bf16 %v2786_v29  ;;  %v2787_v25 = vunpack.i.l.bf16 %v2786_v29 }
 0x48b   : > { %v2312_v41 = vsel %vm1892_vm11, %v2787_v25, %v2788_v0 }
 0x48c   : > { %v2796_v22 = vpop.permute.xlu0 %2795 }
 0x48d   : > { %v2797_v14 = vunpack.i.l.bf16 %v2796_v22  ;;  %v2798_v59 = vunpack.i.h.bf16 %v2796_v22 }
 0x48f   : > { %v2791_v9 = vpop.permute.xlu1 %2790  ;;  %v2311_v10 = vsel %vm1892_vm11, %v2797_v14, %v2787_v25 }
 0x490   : > { %v2793_v58 = vunpack.i.h.bf16 %v2791_v9  ;;  %v2792_v15 = vunpack.i.l.bf16 %v2791_v9 }
 0x492   : > { %v2314_v57 = vsel %vm1892_vm11, %v2792_v15, %v2793_v58  ;;  %v2313_v8 = vsel %vm1892_vm11, %v2798_v59, %v2792_v15 }
 0x493   : > { %v2673_v23 = vpack.c.bf16 %v2314_v57, %v2312_v41  ;;  %v2675_v19 = vpack.c.bf16 %v2313_v8, %v2311_v10 }
 0x495   : > { %2674 = vmatprep.subr.bf16.mxu0 %v2673_v23  ;;  %2680 = vmatprep.subr.bf16.mxu1 %v2673_v23 }
 0x496   : > { %2676 = vmatpush1.bf16.msra.mxu0 %v2675_v19  ;;  %2684 = vmatpush1.bf16.msra.mxu1 %v2675_v19 }
 0x499   : > { %2641 = vmatmul.mubr.msk.f32.vlgmr.msra.gmra.mrb[0].mxu0 %vm2331_vm0, %v2115_v37  ;;  %2649 = vmatmul.mubr.msk.f32.vlgmr.msra.gmra.mrb[0].mxu1 %vm2331_vm0, %v2123_v49 }
 0x49a   : > { %2450 = vmatprep.mubr.f32.mxu0 %v4976_v5  ;;  %2498 = vmatprep.mubr.f32.mxu1 %v4976_v5 }
 0x49d   : > { %2642 = vmatmul.mubr.msk.f32.gmra.mrb[2].mxu0 %vm2331_vm0, %v2116_v27  ;;  %2650 = vmatmul.mubr.msk.f32.gmra.mrb[2].mxu1 %vm2331_vm0, %v2124_v26  ;;  %v2155_v11 = vpop.permute.xlu0 %2154 }
 0x49e   : > { %2456 = vmatprep.mubr.f32.mxu0 %v4976_v5  ;;  %2504 = vmatprep.mubr.f32.mxu1 %v4976_v5 }
 0x4a0   : > { %v2150_v42 = vpop.permute.xlu1 %2149 }
 0x4a1   : > { %2643 = vmatmul.mubr.msk.f32.gmra.mrb[4].mxu0 %vm2331_vm0, %v2117_v55  ;;  %2651 = vmatmul.mubr.msk.f32.gmra.mrb[4].mxu1 %vm2331_vm0, %v2125_v46  ;;  %v2165_v7 = vpop.permute.xlu0 %2164 }
 0x4a2   : > { %2462 = vmatprep.mubr.f32.mxu0 %v4976_v5  ;;  %2510 = vmatprep.mubr.f32.mxu1 %v4976_v5 }
 0x4a4   : > { %v2160_v12 = vpop.permute.xlu1 %2159 }
 0x4a5   : > { %2644 = vmatmul.mubr.msk.f32.gmra.mrb[6].mxu0 %vm2331_vm0, %v2118_v44  ;;  %2652 = vmatmul.mubr.msk.f32.gmra.mrb[6].mxu1 %vm2331_vm0, %v2126_v2  ;;  %v4697_v31 = vpop.permute.xlu0 %2174 }
 0x4a6   : > { %2468 = vmatprep.mubr.f32.mxu0 %v4976_v5  ;;  %2516 = vmatprep.mubr.f32.mxu1 %v4976_v5 }
 0x4a8   : > { %v4695_v52 = vpop.permute.xlu1 %2169 }
 0x4a9   : > { %2645 = vmatmul.mubr.msk.f32.gmra.mrb[8].mxu0 %vm2331_vm0, %v2119_v4  ;;  %2653 = vmatmul.mubr.msk.f32.gmra.mrb[8].mxu1 %vm2331_vm0, %v2127_v60  ;;  %v4702_v39 = vpop.permute.xlu0 %2184 }
 0x4aa   : > { %2474 = vmatprep.mubr.f32.mxu0 %v4976_v5  ;;  %2522 = vmatprep.mubr.f32.mxu1 %v4976_v5 }
 0x4ac   : > { %v4699_v33 = vpop.permute.xlu1 %2179 }
 0x4ad   : > { %2646 = vmatmul.mubr.msk.f32.gmra.mrb[10].mxu0 %vm2331_vm0, %v2120_v50  ;;  %2654 = vmatmul.mubr.msk.f32.gmra.mrb[10].mxu1 %vm2331_vm0, %v2128_v6  ;;  %v2195_v38 = vpop.permute.xlu0 %2194 }
 0x4ae   : > { %2480 = vmatprep.mubr.f32.mxu0 %v4976_v5  ;;  %2528 = vmatprep.mubr.f32.mxu1 %v4976_v5 }
 0x4b0   : > { %v2190_v62 = vpop.permute.xlu1 %2189 }
 0x4b1   : > { %2647 = vmatmul.mubr.msk.f32.gmra.mrb[12].mxu0 %vm2331_vm0, %v2121_v35  ;;  %2655 = vmatmul.mubr.msk.f32.gmra.mrb[12].mxu1 %vm2331_vm0, %v2129_v20  ;;  %v2205_v25 = vpop.permute.xlu0 %2204 }
 0x4b2   : > { %2486 = vmatprep.mubr.f32.mxu0 %v4976_v5  ;;  %2534 = vmatprep.mubr.f32.mxu1 %v4976_v5 }
 0x4b4   : > { %v2200_v54 = vpop.permute.xlu1 %2199 }
 0x4b5   : > { %2648 = vmatmul.mubr.msk.f32.gmra.mrb[14].mxu0 %vm2331_vm0, %v2122_v28  ;;  %2656 = vmatmul.mubr.msk.f32.gmra.mrb[14].mxu1 %vm2331_vm0, %v2130_v61  ;;  %v2215_v46 = vpop.permute.xlu0 %2214 }
 0x4b8   : > { %v2210_v8 = vpop.permute.xlu1 %2209 }
 0x4bc   : > { %v2220_v28 = vpop.permute.xlu1 %2219 }
 0x56c   : > { %v2446_v56 = vpop.f32.mrb[0].mxu0  ;;  %v2494_v51 = vpop.f32.mrb[0].mxu1 }
 0x56d   : > { %v2447_v32 = vadd.f32 %v2446_v56, %v2150_v42  ;;  %v2495_v18 = vadd.f32 %v2494_v51, %v2190_v62  ;;  %v2448_v48 = vpop.f32.mrb[1].mxu0  ;;  %v2496_v30 = vpop.f32.mrb[1].mxu1 }
 0x56e   : > { %v2449_v63 = vadd.f32 %v2448_v48, %v2150_v42  ;;  %v2497_v16 = vadd.f32 %v2496_v30, %v2190_v62  ;;  %v2225_v56 = vpop.permute.xlu0 %2224 }
 0x56f   : > { %2541 = vst [vmem:[%s4707_s13] sm:$0xff] %v2447_v32  ;;  %2557 = vst [vmem:[%s4707_s13 + $0x80] sm:$0xff] %v2495_v18 }
 0x570   : > { %2542 = vst [vmem:[%s4707_s13 + $0x8] sm:$0xff] %v2449_v63  ;;  %2558 = vst [vmem:[%s4707_s13 + $0x88] sm:$0xff] %v2497_v16  ;;  %v2452_v45 = vpop.f32.mrb[2].mxu0  ;;  %v2500_v17 = vpop.f32.mrb[2].mxu1 }
 0x571   : > { %v2453_v3 = vadd.f32 %v2452_v45, %v2155_v11  ;;  %v2501_v34 = vadd.f32 %v2500_v17, %v2195_v38  ;;  %v2454_v13 = vpop.f32.mrb[3].mxu0  ;;  %v2502_v43 = vpop.f32.mrb[3].mxu1 }
 0x572   : > { %v2455_v36 = vadd.f32 %v2454_v13, %v2155_v11  ;;  %v2503_v47 = vadd.f32 %v2502_v43, %v2195_v38 }
 0x573   : > { %2543 = vst [vmem:[%s4707_s13 + $0x10] sm:$0xff] %v2453_v3  ;;  %2559 = vst [vmem:[%s4707_s13 + $0x90] sm:$0xff] %v2501_v34 }
 0x574   : > { %2544 = vst [vmem:[%s4707_s13 + $0x18] sm:$0xff] %v2455_v36  ;;  %2560 = vst [vmem:[%s4707_s13 + $0x98] sm:$0xff] %v2503_v47  ;;  %v2458_v53 = vpop.f32.mrb[4].mxu0  ;;  %v2506_v1 = vpop.f32.mrb[4].mxu1 }
 0x575   : > { %v2459_v24 = vadd.f32 %v2458_v53, %v2160_v12  ;;  %v2507_v21 = vadd.f32 %v2506_v1, %v2200_v54  ;;  %v2460_v40 = vpop.f32.mrb[5].mxu0  ;;  %v2508_v29 = vpop.f32.mrb[5].mxu1 }
 0x576   : > { %v2461_v22 = vadd.f32 %v2460_v40, %v2160_v12  ;;  %v2509_v0 = vadd.f32 %v2508_v29, %v2200_v54 }
 0x577   : > { %2545 = vst [vmem:[%s4707_s13 + $0x20] sm:$0xff] %v2459_v24  ;;  %2561 = vst [vmem:[%s4707_s13 + $0xa0] sm:$0xff] %v2507_v21 }
 0x578   : > { %2546 = vst [vmem:[%s4707_s13 + $0x28] sm:$0xff] %v2461_v22  ;;  %2562 = vst [vmem:[%s4707_s13 + $0xa8] sm:$0xff] %v2509_v0  ;;  %v2464_v14 = vpop.f32.mrb[6].mxu0  ;;  %v2512_v9 = vpop.f32.mrb[6].mxu1 }
 0x579   : > { %v2465_v59 = vadd.f32 %v2464_v14, %v2165_v7  ;;  %v2513_v58 = vadd.f32 %v2512_v9, %v2205_v25  ;;  %v2466_v15 = vpop.f32.mrb[7].mxu0  ;;  %v2514_v41 = vpop.f32.mrb[7].mxu1 }
 0x57a   : > { %v2467_v57 = vadd.f32 %v2466_v15, %v2165_v7  ;;  %v2515_v10 = vadd.f32 %v2514_v41, %v2205_v25 }
 0x57b   : > { %2547 = vst [vmem:[%s4707_s13 + $0x30] sm:$0xff] %v2465_v59  ;;  %2563 = vst [vmem:[%s4707_s13 + $0xb0] sm:$0xff] %v2513_v58 }
 0x57c   : > { %2548 = vst [vmem:[%s4707_s13 + $0x38] sm:$0xff] %v2467_v57  ;;  %2564 = vst [vmem:[%s4707_s13 + $0xb8] sm:$0xff] %v2515_v10  ;;  %v2470_v23 = vpop.f32.mrb[8].mxu0  ;;  %v2518_v19 = vpop.f32.mrb[8].mxu1 }
 0x57d   : > { %v2471_v37 = vadd.f32 %v2470_v23, %v4695_v52  ;;  %v2519_v49 = vadd.f32 %v2518_v19, %v2210_v8  ;;  %v2472_v5 = vpop.f32.mrb[9].mxu0  ;;  %v2520_v27 = vpop.f32.mrb[9].mxu1 }
 0x57e   : > { %v2473_v26 = vadd.f32 %v2472_v5, %v4695_v52  ;;  %v2521_v55 = vadd.f32 %v2520_v27, %v2210_v8 }
 0x57f   : > { %2549 = vst [vmem:[%s4707_s13 + $0x40] sm:$0xff] %v2471_v37  ;;  %2565 = vst [vmem:[%s4707_s13 + $0xc0] sm:$0xff] %v2519_v49 }
 0x580   : > { %2550 = vst [vmem:[%s4707_s13 + $0x48] sm:$0xff] %v2473_v26  ;;  %2566 = vst [vmem:[%s4707_s13 + $0xc8] sm:$0xff] %v2521_v55  ;;  %v2476_v44 = vpop.f32.mrb[10].mxu0  ;;  %v2524_v2 = vpop.f32.mrb[10].mxu1 }
 0x581   : > { %v2477_v4 = vadd.f32 %v2476_v44, %v4697_v31  ;;  %v2525_v60 = vadd.f32 %v2524_v2, %v2215_v46  ;;  %v2478_v50 = vpop.f32.mrb[11].mxu0  ;;  %v2526_v6 = vpop.f32.mrb[11].mxu1 }
 0x582   : > { %v2479_v35 = vadd.f32 %v2478_v50, %v4697_v31  ;;  %v2527_v20 = vadd.f32 %v2526_v6, %v2215_v46 }
 0x583   : > { %2551 = vst [vmem:[%s4707_s13 + $0x50] sm:$0xff] %v2477_v4  ;;  %2567 = vst [vmem:[%s4707_s13 + $0xd0] sm:$0xff] %v2525_v60 }
 0x584   : > { %2552 = vst [vmem:[%s4707_s13 + $0x58] sm:$0xff] %v2479_v35  ;;  %2568 = vst [vmem:[%s4707_s13 + $0xd8] sm:$0xff] %v2527_v20  ;;  %v2482_v61 = vpop.f32.mrb[12].mxu0  ;;  %v2530_v42 = vpop.f32.mrb[12].mxu1 }
 0x585   : > { %v2483_v11 = vadd.f32 %v2482_v61, %v4699_v33  ;;  %v2531_v12 = vadd.f32 %v2530_v42, %v2220_v28  ;;  %v2484_v7 = vpop.f32.mrb[13].mxu0  ;;  %v2532_v52 = vpop.f32.mrb[13].mxu1 }
 0x586   : > { %v2485_v31 = vadd.f32 %v2484_v7, %v4699_v33  ;;  %v2533_v62 = vadd.f32 %v2532_v52, %v2220_v28 }
 0x587   : > { %2553 = vst [vmem:[%s4707_s13 + $0x60] sm:$0xff] %v2483_v11  ;;  %2569 = vst [vmem:[%s4707_s13 + $0xe0] sm:$0xff] %v2531_v12 }
 0x588   : > { %2554 = vst [vmem:[%s4707_s13 + $0x68] sm:$0xff] %v2485_v31  ;;  %2570 = vst [vmem:[%s4707_s13 + $0xe8] sm:$0xff] %v2533_v62  ;;  %v2488_v51 = vpop.f32.mrb[14].mxu0  ;;  %v2536_v32 = vpop.f32.mrb[14].mxu1 }
 0x589   : > { %v2489_v18 = vadd.f32 %v2488_v51, %v4702_v39  ;;  %v2537_v48 = vadd.f32 %v2536_v32, %v2225_v56  ;;  %v2490_v30 = vpop.f32.mrb[15].mxu0  ;;  %v2538_v63 = vpop.f32.mrb[15].mxu1 }
 0x58a   : > { %v2491_v16 = vadd.f32 %v2490_v30, %v4702_v39  ;;  %v2539_v38 = vadd.f32 %v2538_v63, %v2225_v56 }
 0x58b   : > { %2555 = vst [vmem:[%s4707_s13 + $0x70] sm:$0xff] %v2489_v18  ;;  %2571 = vst [vmem:[%s4707_s13 + $0xf0] sm:$0xff] %v2537_v48 }
 0x58c   : > { %2556 = vst [vmem:[%s4707_s13 + $0x78] sm:$0xff] %v2491_v16  ;;  %2572 = vst [vmem:[%s4707_s13 + $0xf8] sm:$0xff] %v2539_v38 }
 0x58d PF: > { %s14_s15 = sadd.s32 1, %s2821_s15  }
 0x58e   : > { %p11_p4 = scmp.ge.s32.totalorder %s14_s15, 4  }
 0x590   :  { %13 = sbr.rel (!%p11_p4) target bundleno = 1 (0x1), region = 66 }

</bundles_post_ra>
